<compile_context>
chip_gen: v6e
topology: v6e:2x2x1
jax: 0.10.0
libtpu: 0.0.40
codegen_flags: <defaults>
</compile_context>

<pallas_src>
import jax
import jax.numpy as jnp
from jax.experimental import pallas as pl
from jax.experimental.pallas import tpu as pltpu

# ----------------------------- model hyper-params -----------------------------
CORPUS_SIZE = 50
EMBED_DIM = 16
HIDDEN_DIM = 32          # 4H = 128 -> gates are exactly one lane-width
N_LAYERS = 2
OUTPUT_SIZE = 5
BATCH = 16
SEQ_LEN = 8
FC_PAD = 128             # lane-padded fc output width (== 4*HIDDEN_DIM)


def _pick_batch_block(batch):
    """One recurrence chain per TensorCore.

    v5e / v6e have 1 TC per chip: grid=(2,) would just serialize two T=8
    chains back-to-back, so run the whole batch as a single block.
    v7x has 2 TCs: split the batch in two and let 'parallel' semantics place
    one block per core.
    """
    try:
        kind = jax.devices()[0].device_kind.lower()
    except Exception:
        kind = ""
    if "v7" in kind and batch % 2 == 0 and (batch // 2) >= 8:
        return batch // 2
    return batch


# --------------------------------- Pallas kernel ------------------------------
def sentiment_lstm_kernel(xg_ref,        # (T*BB, 4H) f32  pre-scaled layer-0 gate pre-activations
                          state_ref,     # (BB, 4H)   f32  packed [h_l0 | h_l1 | c_l0 | c_l1]
                          w_ref,         # (4H, 128)  bf16 packed [whh0*s; wih1*s; whh1*s; wfc_pad]
                          b_ref,         # (2, 128)   f32  packed [b1*s; bfc_pad]
                          out_ref,       # (BB, 128)  f32  sigmoid(fc(h_T top layer)), lane-padded
                          stateout_ref): # (BB, 4H)   f32  packed final states
    H = HIDDEN_DIM
    BB = state_ref.shape[0]
    T = xg_ref.shape[0] // BB

    # Constant weight slices, loaded once (bf16 keeps the live vreg set small).
    whh0 = w_ref[0 * H:1 * H, :]
    wih1 = w_ref[1 * H:2 * H, :]
    whh1 = w_ref[2 * H:3 * H, :]
    wfc = w_ref[3 * H:4 * H, :]
    b1 = b_ref[0:1, :]
    bfc = b_ref[1:2, :]

    state = state_ref[...]
    h_l0 = state[:, 0 * H:1 * H]
    h_l1 = state[:, 1 * H:2 * H]
    c_l0 = state[:, 2 * H:3 * H]
    c_l1 = state[:, 3 * H:4 * H]

    def activate(g):
        # Gate columns of the weights/biases were pre-scaled by 0.5 on the
        # i/f/o lanes (1.0 on g lanes), so sigmoid(x) == 0.5*tanh(x/2)+0.5
        # becomes a SINGLE tanh EUP push on the full (BB, 128) vreg plus
        # cheap VPU fixups.  PyTorch gate order [i, f, g, o].
        t = jnp.tanh(g)
        i = 0.5 * t[:, 0 * H:1 * H] + 0.5
        f = 0.5 * t[:, 1 * H:2 * H] + 0.5
        gg = t[:, 2 * H:3 * H]
        o = 0.5 * t[:, 3 * H:4 * H] + 0.5
        return i, f, gg, o

    # T is small and static: fully unrolled.  x-gate slices are re-loaded from
    # VMEM per step so they do not pin vregs across the whole unrolled chain.
    for t in range(T):
        # ----- layer 0: only the recurrent matmul remains on the serial chain -----
        x_t = xg_ref[pl.ds(t * BB, BB), :]
        g0 = x_t + jnp.dot(h_l0.astype(jnp.bfloat16), whh0,
                           preferred_element_type=jnp.float32)
        i0, f0, gg0, o0 = activate(g0)
        c_l0 = f0 * c_l0 + i0 * gg0
        h_l0 = o0 * jnp.tanh(c_l0)

        # ----- layer 1: two MXU pushes, no per-step concat -----
        g1 = (jnp.dot(h_l0.astype(jnp.bfloat16), wih1,
                      preferred_element_type=jnp.float32)
              + jnp.dot(h_l1.astype(jnp.bfloat16), whh1,
                        preferred_element_type=jnp.float32)
              + b1)
        i1, f1, gg1, o1 = activate(g1)
        c_l1 = f1 * c_l1 + i1 * gg1
        h_l1 = o1 * jnp.tanh(c_l1)

    # Lane-dense packed final states -> one unmasked (BB, 128) store.
    stateout_ref[...] = jnp.concatenate([h_l0, h_l1, c_l0, c_l1], axis=-1)

    # fc + sigmoid on the last timestep of the top layer, lane-padded to 128.
    # Equals out.view(B, -1)[:, -output_size:] in the PyTorch module.
    logits = jnp.dot(h_l1.astype(jnp.bfloat16), wfc,
                     preferred_element_type=jnp.float32) + bfc
    out_ref[...] = jax.nn.sigmoid(logits)


# --------------------------------- wrapper -------------------------------------
@jax.jit
def sentiment_lstm_forward(x, hidden, params):
    """Mirror SentimentLSTM.forward(x, hidden) -> (out, (h_n, c_n))."""
    B, T = x.shape
    H = params["whh0"].shape[0]
    O = params["wfc"].shape[1]
    G = 4 * H

    BB = _pick_batch_block(B)
    assert B % BB == 0, "batch must be divisible by the batch block"
    nb = B // BB

    # Column scale implementing sigmoid(x) = 0.5*tanh(x/2) + 0.5 on i/f/o lanes.
    gate_scale = jnp.concatenate(
        [jnp.full((1, H), 0.5, jnp.float32),      # i
         jnp.full((1, H), 0.5, jnp.float32),      # f
         jnp.ones((1, H), jnp.float32),           # g (plain tanh)
         jnp.full((1, H), 0.5, jnp.float32)],     # o
        axis=-1)

    # Fold nn.Embedding + layer-0 input projection + bias (+ gate scaling) into
    # a token->gate table, then gather it: the kernel input is already (.., 128).
    token_gates = (params["embedding"] @ params["wih0"] + params["b0"]) * gate_scale
    x_gates = jnp.take(token_gates, x, axis=0)                       # (B, T, 4H)
    # Time-major inside each batch block -> static (BB, 4H) slices per step.
    xg_blocks = (x_gates.reshape(nb, BB, T, G)
                        .transpose(0, 2, 1, 3)
                        .reshape(nb, T * BB, G))

    # Packed lane-dense initial state [h_l0 | h_l1 | c_l0 | c_l1].
    h0, c0 = hidden
    state_in = jnp.concatenate([h0[0], h0[1], c0[0], c0[1]], axis=-1)  # (B, 4H)

    # One packed bf16 weight block and one packed f32 bias block.
    wfc_p = jnp.pad(params["wfc"], ((0, 0), (0, FC_PAD - O)))          # (H, 128)
    bfc_p = jnp.pad(params["bfc"], ((0, 0), (0, FC_PAD - O)))          # (1, 128)
    w_pack = jnp.concatenate([params["whh0"] * gate_scale,
                              params["wih1"] * gate_scale,
                              params["whh1"] * gate_scale,
                              wfc_p], axis=0).astype(jnp.bfloat16)     # (4H, 128)
    b_pack = jnp.concatenate([params["b1"] * gate_scale, bfc_p], axis=0)  # (2, 128)

    out_p, state_out = pl.pallas_call(
        sentiment_lstm_kernel,
        out_shape=(
            jax.ShapeDtypeStruct((B, FC_PAD), jnp.float32),
            jax.ShapeDtypeStruct((B, G), jnp.float32),
        ),
        grid=(nb,),
        in_specs=[
            pl.BlockSpec((None, T * BB, G), lambda j: (j, 0, 0)),   # x gate pre-activations
            pl.BlockSpec((BB, G), lambda j: (j, 0)),                # packed initial state
            pl.BlockSpec((G, FC_PAD), lambda j: (0, 0)),            # packed bf16 weights
            pl.BlockSpec((2, FC_PAD), lambda j: (0, 0)),            # packed biases
        ],
        out_specs=(
            pl.BlockSpec((BB, FC_PAD), lambda j: (j, 0)),
            pl.BlockSpec((BB, G), lambda j: (j, 0)),
        ),
        compiler_params=pltpu.CompilerParams(
            dimension_semantics=("parallel",)),   # 2nd TensorCore on v7x; no-op on 1-TC chips
    )(xg_blocks, state_in, w_pack, b_pack)

    hn = jnp.stack([state_out[:, 0 * H:1 * H], state_out[:, 1 * H:2 * H]])
    cn = jnp.stack([state_out[:, 2 * H:3 * H], state_out[:, 3 * H:4 * H]])
    return out_p[:, :O], (hn, cn)


# ---------------------------- pure-JAX reference --------------------------------
def reference_forward(x, hidden, params):
    emb = jnp.take(params["embedding"], x, axis=0)        # (B, T, E)
    H = params["whh0"].shape[0]
    h0, c0 = hidden

    def cell(x_t, h, c, wih, whh, b):
        g = x_t @ wih + h @ whh + b
        i = jax.nn.sigmoid(g[:, 0 * H:1 * H])
        f = jax.nn.sigmoid(g[:, 1 * H:2 * H])
        gg = jnp.tanh(g[:, 2 * H:3 * H])
        o = jax.nn.sigmoid(g[:, 3 * H:4 * H])
        c_new = f * c + i * gg
        return o * jnp.tanh(c_new), c_new

    def step(carry, x_t):
        h_l0, c_l0, h_l1, c_l1 = carry
        h_l0, c_l0 = cell(x_t, h_l0, c_l0, params["wih0"], params["whh0"], params["b0"])
        h_l1, c_l1 = cell(h_l0, h_l1, c_l1, params["wih1"], params["whh1"], params["b1"])
        return (h_l0, c_l0, h_l1, c_l1), h_l1

    carry = (h0[0], c0[0], h0[1], c0[1])
    carry, _ = jax.lax.scan(step, carry, jnp.transpose(emb, (1, 0, 2)))
    h_l0, c_l0, h_l1, c_l1 = carry
    out = jax.nn.sigmoid(h_l1 @ params["wfc"] + params["bfc"])
    return out, (jnp.stack([h_l0, h_l1]), jnp.stack([c_l0, c_l1]))


# --------------------------------- param init -----------------------------------
def init_params(key):
    keys = jax.random.split(key, 12)
    k = 1.0 / jnp.sqrt(HIDDEN_DIM)

    def u(rng, shape):
        return jax.random.uniform(rng, shape, jnp.float32, -k, k)

    params = {
        # nn.Embedding.from_pretrained(weights_matrix) -- synthetic pretrained table
        "embedding": jax.random.normal(keys[0], (CORPUS_SIZE, EMBED_DIM), jnp.float32),
        # LSTM layer 0 (PyTorch shapes (4H, E)/(4H, H); stored transposed here)
        "wih0": u(keys[1], (EMBED_DIM, 4 * HIDDEN_DIM)),
        "whh0": u(keys[2], (HIDDEN_DIM, 4 * HIDDEN_DIM)),
        "b0": u(keys[3], (1, 4 * HIDDEN_DIM)) + u(keys[4], (1, 4 * HIDDEN_DIM)),  # bias_ih + bias_hh
        # LSTM layer 1
        "wih1": u(keys[5], (HIDDEN_DIM, 4 * HIDDEN_DIM)),
        "whh1": u(keys[6], (HIDDEN_DIM, 4 * HIDDEN_DIM)),
        "b1": u(keys[7], (1, 4 * HIDDEN_DIM)) + u(keys[8], (1, 4 * HIDDEN_DIM)),
        # fc: Linear(hidden_dim, output_size)
        "wfc": u(keys[9], (HIDDEN_DIM, OUTPUT_SIZE)),
        "bfc": u(keys[10], (1, OUTPUT_SIZE)),
    }
    return params


# ------------------------------------ main --------------------------------------
if __name__ == "__main__":
    root = jax.random.PRNGKey(0)
    k_params, k_x = jax.random.split(root)

    params = init_params(k_params)

    # token ids, like the PyTorch module's integer input x of shape (batch, seq)
    x = jax.random.randint(k_x, (BATCH, SEQ_LEN), 0, CORPUS_SIZE, dtype=jnp.int32)

    # init_hidden(batch_size): zeros of shape (n_layers, batch, hidden_dim)
    hidden = (jnp.zeros((N_LAYERS, BATCH, HIDDEN_DIM), jnp.float32),
              jnp.zeros((N_LAYERS, BATCH, HIDDEN_DIM), jnp.float32))

    out, (hn, cn) = sentiment_lstm_forward(x, hidden, params)
    out = jax.block_until_ready(out)
    hn = jax.block_until_ready(hn)
    cn = jax.block_until_ready(cn)

    assert out.shape == (BATCH, OUTPUT_SIZE)
    assert hn.shape == (N_LAYERS, BATCH, HIDDEN_DIM)
    assert cn.shape == (N_LAYERS, BATCH, HIDDEN_DIM)

    # sanity check against a pure-JAX f32 reference of the same math
    # (kernel uses bf16 MXU operands -> slightly relaxed tolerance)
    ref_out, (ref_hn, ref_cn) = reference_forward(x, hidden, params)
    assert jnp.allclose(out, ref_out, atol=2e-2, rtol=2e-2)
    assert jnp.allclose(hn, ref_hn, atol=2e-2, rtol=2e-2)
    assert jnp.allclose(cn, ref_cn, atol=2e-2, rtol=2e-2)

    print("KERNEL_OK")
</pallas_src>

<mosaic_0001>
module attributes {stable_mosaic.version = 11 : i64} {
  func.func @sentiment_lstm_kernel(%arg0: i32, %arg1: memref<1x128x128xf32, #tpu.memory_space<vmem>>, %arg2: memref<16x128xf32, #tpu.memory_space<vmem>>, %arg3: memref<128x128xbf16, #tpu.memory_space<vmem>>, %arg4: memref<2x128xf32, #tpu.memory_space<vmem>>, %arg5: memref<16x128xf32, #tpu.memory_space<vmem>>, %arg6: memref<16x128xf32, #tpu.memory_space<vmem>>) attributes {dimension_semantics = [#tpu.dimension_semantics<parallel>], iteration_bounds = array<i64: 1>, scalar_prefetch = 0 : i64, scratch_operands = 0 : i64, tpu.core_type = #tpu.core_type<tc>, window_params = [{transform_indices = @transform_0, window_bounds = array<i64: 1, 128, 128>}, {transform_indices = @transform_1, window_bounds = array<i64: 16, 128>}, {pipeline_mode = #tpu.pipeline_mode<synchronous>, transform_indices = @transform_2, window_bounds = array<i64: 128, 128>}, {pipeline_mode = #tpu.pipeline_mode<synchronous>, transform_indices = @transform_3, window_bounds = array<i64: 2, 128>}, {transform_indices = @transform_4, window_bounds = array<i64: 16, 128>}, {transform_indices = @transform_5, window_bounds = array<i64: 16, 128>}]} {
    %c0 = arith.constant 0 : index
    %c0_0 = arith.constant 0 : index
    %0 = vector.load %arg3[%c0, %c0_0] : memref<128x128xbf16, #tpu.memory_space<vmem>>, vector<32x128xbf16>
    %c32 = arith.constant 32 : index
    %c0_1 = arith.constant 0 : index
    %1 = vector.load %arg3[%c32, %c0_1] : memref<128x128xbf16, #tpu.memory_space<vmem>>, vector<32x128xbf16>
    %c64 = arith.constant 64 : index
    %c0_2 = arith.constant 0 : index
    %2 = vector.load %arg3[%c64, %c0_2] : memref<128x128xbf16, #tpu.memory_space<vmem>>, vector<32x128xbf16>
    %c96 = arith.constant 96 : index
    %c0_3 = arith.constant 0 : index
    %3 = vector.load %arg3[%c96, %c0_3] : memref<128x128xbf16, #tpu.memory_space<vmem>>, vector<32x128xbf16>
    %c0_4 = arith.constant 0 : index
    %c0_5 = arith.constant 0 : index
    %4 = vector.load %arg4[%c0_4, %c0_5] : memref<2x128xf32, #tpu.memory_space<vmem>>, vector<1x128xf32>
    %c1 = arith.constant 1 : index
    %c0_6 = arith.constant 0 : index
    %5 = vector.load %arg4[%c1, %c0_6] : memref<2x128xf32, #tpu.memory_space<vmem>>, vector<1x128xf32>
    %c0_7 = arith.constant 0 : index
    %c0_8 = arith.constant 0 : index
    %6 = vector.load %arg2[%c0_7, %c0_8] : memref<16x128xf32, #tpu.memory_space<vmem>>, vector<16x128xf32>
    %7 = vector.extract_strided_slice %6 {offsets = [0, 0], sizes = [16, 32], strides = [1, 1]} : vector<16x128xf32> to vector<16x32xf32>
    %8 = vector.extract_strided_slice %6 {offsets = [0, 32], sizes = [16, 32], strides = [1, 1]} : vector<16x128xf32> to vector<16x32xf32>
    %9 = vector.extract_strided_slice %6 {offsets = [0, 64], sizes = [16, 32], strides = [1, 1]} : vector<16x128xf32> to vector<16x32xf32>
    %10 = vector.extract_strided_slice %6 {offsets = [0, 96], sizes = [16, 32], strides = [1, 1]} : vector<16x128xf32> to vector<16x32xf32>
    %c0_9 = arith.constant 0 : index
    %c0_10 = arith.constant 0 : index
    %c0_11 = arith.constant 0 : index
    %11 = vector.load %arg1[%c0_9, %c0_10, %c0_11] : memref<1x128x128xf32, #tpu.memory_space<vmem>>, vector<1x16x128xf32>
    %12 = vector.shape_cast %11 : vector<1x16x128xf32> to vector<16x128xf32>
    %13 = arith.truncf %7 : vector<16x32xf32> to vector<16x32xbf16>
    %cst = arith.constant dense<0.000000e+00> : vector<16x128xf32>
    %14 = tpu.matmul %13, %0, %cst {dimension_numbers = #tpu.dot_dimension_numbers<[1], [0], [0], [1], [0, 0, 1, 1], [], []>} : vector<16x32xbf16>, vector<32x128xbf16>, vector<16x128xf32> -> vector<16x128xf32>
    %15 = arith.addf %12, %14 : vector<16x128xf32>
    %16 = math.tanh %15 : vector<16x128xf32>
    %17 = vector.extract_strided_slice %16 {offsets = [0, 0], sizes = [16, 32], strides = [1, 1]} : vector<16x128xf32> to vector<16x32xf32>
    %cst_12 = arith.constant 5.000000e-01 : f32
    %18 = vector.broadcast %cst_12 : f32 to vector<16x32xf32>
    %19 = arith.mulf %18, %17 : vector<16x32xf32>
    %cst_13 = arith.constant 5.000000e-01 : f32
    %20 = vector.broadcast %cst_13 : f32 to vector<16x32xf32>
    %21 = arith.addf %19, %20 : vector<16x32xf32>
    %22 = vector.extract_strided_slice %16 {offsets = [0, 32], sizes = [16, 32], strides = [1, 1]} : vector<16x128xf32> to vector<16x32xf32>
    %cst_14 = arith.constant 5.000000e-01 : f32
    %23 = vector.broadcast %cst_14 : f32 to vector<16x32xf32>
    %24 = arith.mulf %23, %22 : vector<16x32xf32>
    %cst_15 = arith.constant 5.000000e-01 : f32
    %25 = vector.broadcast %cst_15 : f32 to vector<16x32xf32>
    %26 = arith.addf %24, %25 : vector<16x32xf32>
    %27 = vector.extract_strided_slice %16 {offsets = [0, 64], sizes = [16, 32], strides = [1, 1]} : vector<16x128xf32> to vector<16x32xf32>
    %28 = vector.extract_strided_slice %16 {offsets = [0, 96], sizes = [16, 32], strides = [1, 1]} : vector<16x128xf32> to vector<16x32xf32>
    %cst_16 = arith.constant 5.000000e-01 : f32
    %29 = vector.broadcast %cst_16 : f32 to vector<16x32xf32>
    %30 = arith.mulf %29, %28 : vector<16x32xf32>
    %cst_17 = arith.constant 5.000000e-01 : f32
    %31 = vector.broadcast %cst_17 : f32 to vector<16x32xf32>
    %32 = arith.addf %30, %31 : vector<16x32xf32>
    %33 = arith.mulf %26, %9 : vector<16x32xf32>
    %34 = arith.mulf %21, %27 : vector<16x32xf32>
    %35 = arith.addf %33, %34 : vector<16x32xf32>
    %36 = math.tanh %35 : vector<16x32xf32>
    %37 = arith.mulf %32, %36 : vector<16x32xf32>
    %38 = arith.truncf %37 : vector<16x32xf32> to vector<16x32xbf16>
    %cst_18 = arith.constant dense<0.000000e+00> : vector<16x128xf32>
    %39 = tpu.matmul %38, %1, %cst_18 {dimension_numbers = #tpu.dot_dimension_numbers<[1], [0], [0], [1], [0, 0, 1, 1], [], []>} : vector<16x32xbf16>, vector<32x128xbf16>, vector<16x128xf32> -> vector<16x128xf32>
    %40 = arith.truncf %8 : vector<16x32xf32> to vector<16x32xbf16>
    %cst_19 = arith.constant dense<0.000000e+00> : vector<16x128xf32>
    %41 = tpu.matmul %40, %2, %cst_19 {dimension_numbers = #tpu.dot_dimension_numbers<[1], [0], [0], [1], [0, 0, 1, 1], [], []>} : vector<16x32xbf16>, vector<32x128xbf16>, vector<16x128xf32> -> vector<16x128xf32>
    %42 = arith.addf %39, %41 : vector<16x128xf32>
    %43 = vector.broadcast %4 : vector<1x128xf32> to vector<16x128xf32>
    %44 = arith.addf %42, %43 : vector<16x128xf32>
    %45 = math.tanh %44 : vector<16x128xf32>
    %46 = vector.extract_strided_slice %45 {offsets = [0, 0], sizes = [16, 32], strides = [1, 1]} : vector<16x128xf32> to vector<16x32xf32>
    %cst_20 = arith.constant 5.000000e-01 : f32
    %47 = vector.broadcast %cst_20 : f32 to vector<16x32xf32>
    %48 = arith.mulf %47, %46 : vector<16x32xf32>
    %cst_21 = arith.constant 5.000000e-01 : f32
    %49 = vector.broadcast %cst_21 : f32 to vector<16x32xf32>
    %50 = arith.addf %48, %49 : vector<16x32xf32>
    %51 = vector.extract_strided_slice %45 {offsets = [0, 32], sizes = [16, 32], strides = [1, 1]} : vector<16x128xf32> to vector<16x32xf32>
    %cst_22 = arith.constant 5.000000e-01 : f32
    %52 = vector.broadcast %cst_22 : f32 to vector<16x32xf32>
    %53 = arith.mulf %52, %51 : vector<16x32xf32>
    %cst_23 = arith.constant 5.000000e-01 : f32
    %54 = vector.broadcast %cst_23 : f32 to vector<16x32xf32>
    %55 = arith.addf %53, %54 : vector<16x32xf32>
    %56 = vector.extract_strided_slice %45 {offsets = [0, 64], sizes = [16, 32], strides = [1, 1]} : vector<16x128xf32> to vector<16x32xf32>
    %57 = vector.extract_strided_slice %45 {offsets = [0, 96], sizes = [16, 32], strides = [1, 1]} : vector<16x128xf32> to vector<16x32xf32>
    %cst_24 = arith.constant 5.000000e-01 : f32
    %58 = vector.broadcast %cst_24 : f32 to vector<16x32xf32>
    %59 = arith.mulf %58, %57 : vector<16x32xf32>
    %cst_25 = arith.constant 5.000000e-01 : f32
    %60 = vector.broadcast %cst_25 : f32 to vector<16x32xf32>
    %61 = arith.addf %59, %60 : vector<16x32xf32>
    %62 = arith.mulf %55, %10 : vector<16x32xf32>
    %63 = arith.mulf %50, %56 : vector<16x32xf32>
    %64 = arith.addf %62, %63 : vector<16x32xf32>
    %65 = math.tanh %64 : vector<16x32xf32>
    %66 = arith.mulf %61, %65 : vector<16x32xf32>
    %c0_26 = arith.constant 0 : index
    %c16 = arith.constant 16 : index
    %c0_27 = arith.constant 0 : index
    %67 = vector.load %arg1[%c0_26, %c16, %c0_27] : memref<1x128x128xf32, #tpu.memory_space<vmem>>, vector<1x16x128xf32>
    %68 = vector.shape_cast %67 : vector<1x16x128xf32> to vector<16x128xf32>
    %69 = arith.truncf %37 : vector<16x32xf32> to vector<16x32xbf16>
    %cst_28 = arith.constant dense<0.000000e+00> : vector<16x128xf32>
    %70 = tpu.matmul %69, %0, %cst_28 {dimension_numbers = #tpu.dot_dimension_numbers<[1], [0], [0], [1], [0, 0, 1, 1], [], []>} : vector<16x32xbf16>, vector<32x128xbf16>, vector<16x128xf32> -> vector<16x128xf32>
    %71 = arith.addf %68, %70 : vector<16x128xf32>
    %72 = math.tanh %71 : vector<16x128xf32>
    %73 = vector.extract_strided_slice %72 {offsets = [0, 0], sizes = [16, 32], strides = [1, 1]} : vector<16x128xf32> to vector<16x32xf32>
    %cst_29 = arith.constant 5.000000e-01 : f32
    %74 = vector.broadcast %cst_29 : f32 to vector<16x32xf32>
    %75 = arith.mulf %74, %73 : vector<16x32xf32>
    %cst_30 = arith.constant 5.000000e-01 : f32
    %76 = vector.broadcast %cst_30 : f32 to vector<16x32xf32>
    %77 = arith.addf %75, %76 : vector<16x32xf32>
    %78 = vector.extract_strided_slice %72 {offsets = [0, 32], sizes = [16, 32], strides = [1, 1]} : vector<16x128xf32> to vector<16x32xf32>
    %cst_31 = arith.constant 5.000000e-01 : f32
    %79 = vector.broadcast %cst_31 : f32 to vector<16x32xf32>
    %80 = arith.mulf %79, %78 : vector<16x32xf32>
    %cst_32 = arith.constant 5.000000e-01 : f32
    %81 = vector.broadcast %cst_32 : f32 to vector<16x32xf32>
    %82 = arith.addf %80, %81 : vector<16x32xf32>
    %83 = vector.extract_strided_slice %72 {offsets = [0, 64], sizes = [16, 32], strides = [1, 1]} : vector<16x128xf32> to vector<16x32xf32>
    %84 = vector.extract_strided_slice %72 {offsets = [0, 96], sizes = [16, 32], strides = [1, 1]} : vector<16x128xf32> to vector<16x32xf32>
    %cst_33 = arith.constant 5.000000e-01 : f32
    %85 = vector.broadcast %cst_33 : f32 to vector<16x32xf32>
    %86 = arith.mulf %85, %84 : vector<16x32xf32>
    %cst_34 = arith.constant 5.000000e-01 : f32
    %87 = vector.broadcast %cst_34 : f32 to vector<16x32xf32>
    %88 = arith.addf %86, %87 : vector<16x32xf32>
    %89 = arith.mulf %82, %35 : vector<16x32xf32>
    %90 = arith.mulf %77, %83 : vector<16x32xf32>
    %91 = arith.addf %89, %90 : vector<16x32xf32>
    %92 = math.tanh %91 : vector<16x32xf32>
    %93 = arith.mulf %88, %92 : vector<16x32xf32>
    %94 = arith.truncf %93 : vector<16x32xf32> to vector<16x32xbf16>
    %cst_35 = arith.constant dense<0.000000e+00> : vector<16x128xf32>
    %95 = tpu.matmul %94, %1, %cst_35 {dimension_numbers = #tpu.dot_dimension_numbers<[1], [0], [0], [1], [0, 0, 1, 1], [], []>} : vector<16x32xbf16>, vector<32x128xbf16>, vector<16x128xf32> -> vector<16x128xf32>
    %96 = arith.truncf %66 : vector<16x32xf32> to vector<16x32xbf16>
    %cst_36 = arith.constant dense<0.000000e+00> : vector<16x128xf32>
    %97 = tpu.matmul %96, %2, %cst_36 {dimension_numbers = #tpu.dot_dimension_numbers<[1], [0], [0], [1], [0, 0, 1, 1], [], []>} : vector<16x32xbf16>, vector<32x128xbf16>, vector<16x128xf32> -> vector<16x128xf32>
    %98 = arith.addf %95, %97 : vector<16x128xf32>
    %99 = vector.broadcast %4 : vector<1x128xf32> to vector<16x128xf32>
    %100 = arith.addf %98, %99 : vector<16x128xf32>
    %101 = math.tanh %100 : vector<16x128xf32>
    %102 = vector.extract_strided_slice %101 {offsets = [0, 0], sizes = [16, 32], strides = [1, 1]} : vector<16x128xf32> to vector<16x32xf32>
    %cst_37 = arith.constant 5.000000e-01 : f32
    %103 = vector.broadcast %cst_37 : f32 to vector<16x32xf32>
    %104 = arith.mulf %103, %102 : vector<16x32xf32>
    %cst_38 = arith.constant 5.000000e-01 : f32
    %105 = vector.broadcast %cst_38 : f32 to vector<16x32xf32>
    %106 = arith.addf %104, %105 : vector<16x32xf32>
    %107 = vector.extract_strided_slice %101 {offsets = [0, 32], sizes = [16, 32], strides = [1, 1]} : vector<16x128xf32> to vector<16x32xf32>
    %cst_39 = arith.constant 5.000000e-01 : f32
    %108 = vector.broadcast %cst_39 : f32 to vector<16x32xf32>
    %109 = arith.mulf %108, %107 : vector<16x32xf32>
    %cst_40 = arith.constant 5.000000e-01 : f32
    %110 = vector.broadcast %cst_40 : f32 to vector<16x32xf32>
    %111 = arith.addf %109, %110 : vector<16x32xf32>
    %112 = vector.extract_strided_slice %101 {offsets = [0, 64], sizes = [16, 32], strides = [1, 1]} : vector<16x128xf32> to vector<16x32xf32>
    %113 = vector.extract_strided_slice %101 {offsets = [0, 96], sizes = [16, 32], strides = [1, 1]} : vector<16x128xf32> to vector<16x32xf32>
    %cst_41 = arith.constant 5.000000e-01 : f32
    %114 = vector.broadcast %cst_41 : f32 to vector<16x32xf32>
    %115 = arith.mulf %114, %113 : vector<16x32xf32>
    %cst_42 = arith.constant 5.000000e-01 : f32
    %116 = vector.broadcast %cst_42 : f32 to vector<16x32xf32>
    %117 = arith.addf %115, %116 : vector<16x32xf32>
    %118 = arith.mulf %111, %64 : vector<16x32xf32>
    %119 = arith.mulf %106, %112 : vector<16x32xf32>
    %120 = arith.addf %118, %119 : vector<16x32xf32>
    %121 = math.tanh %120 : vector<16x32xf32>
    %122 = arith.mulf %117, %121 : vector<16x32xf32>
    %c0_43 = arith.constant 0 : index
    %c32_44 = arith.constant 32 : index
    %c0_45 = arith.constant 0 : index
    %123 = vector.load %arg1[%c0_43, %c32_44, %c0_45] : memref<1x128x128xf32, #tpu.memory_space<vmem>>, vector<1x16x128xf32>
    %124 = vector.shape_cast %123 : vector<1x16x128xf32> to vector<16x128xf32>
    %125 = arith.truncf %93 : vector<16x32xf32> to vector<16x32xbf16>
    %cst_46 = arith.constant dense<0.000000e+00> : vector<16x128xf32>
    %126 = tpu.matmul %125, %0, %cst_46 {dimension_numbers = #tpu.dot_dimension_numbers<[1], [0], [0], [1], [0, 0, 1, 1], [], []>} : vector<16x32xbf16>, vector<32x128xbf16>, vector<16x128xf32> -> vector<16x128xf32>
    %127 = arith.addf %124, %126 : vector<16x128xf32>
    %128 = math.tanh %127 : vector<16x128xf32>
    %129 = vector.extract_strided_slice %128 {offsets = [0, 0], sizes = [16, 32], strides = [1, 1]} : vector<16x128xf32> to vector<16x32xf32>
    %cst_47 = arith.constant 5.000000e-01 : f32
    %130 = vector.broadcast %cst_47 : f32 to vector<16x32xf32>
    %131 = arith.mulf %130, %129 : vector<16x32xf32>
    %cst_48 = arith.constant 5.000000e-01 : f32
    %132 = vector.broadcast %cst_48 : f32 to vector<16x32xf32>
    %133 = arith.addf %131, %132 : vector<16x32xf32>
    %134 = vector.extract_strided_slice %128 {offsets = [0, 32], sizes = [16, 32], strides = [1, 1]} : vector<16x128xf32> to vector<16x32xf32>
    %cst_49 = arith.constant 5.000000e-01 : f32
    %135 = vector.broadcast %cst_49 : f32 to vector<16x32xf32>
    %136 = arith.mulf %135, %134 : vector<16x32xf32>
    %cst_50 = arith.constant 5.000000e-01 : f32
    %137 = vector.broadcast %cst_50 : f32 to vector<16x32xf32>
    %138 = arith.addf %136, %137 : vector<16x32xf32>
    %139 = vector.extract_strided_slice %128 {offsets = [0, 64], sizes = [16, 32], strides = [1, 1]} : vector<16x128xf32> to vector<16x32xf32>
    %140 = vector.extract_strided_slice %128 {offsets = [0, 96], sizes = [16, 32], strides = [1, 1]} : vector<16x128xf32> to vector<16x32xf32>
    %cst_51 = arith.constant 5.000000e-01 : f32
    %141 = vector.broadcast %cst_51 : f32 to vector<16x32xf32>
    %142 = arith.mulf %141, %140 : vector<16x32xf32>
    %cst_52 = arith.constant 5.000000e-01 : f32
    %143 = vector.broadcast %cst_52 : f32 to vector<16x32xf32>
    %144 = arith.addf %142, %143 : vector<16x32xf32>
    %145 = arith.mulf %138, %91 : vector<16x32xf32>
    %146 = arith.mulf %133, %139 : vector<16x32xf32>
    %147 = arith.addf %145, %146 : vector<16x32xf32>
    %148 = math.tanh %147 : vector<16x32xf32>
    %149 = arith.mulf %144, %148 : vector<16x32xf32>
    %150 = arith.truncf %149 : vector<16x32xf32> to vector<16x32xbf16>
    %cst_53 = arith.constant dense<0.000000e+00> : vector<16x128xf32>
    %151 = tpu.matmul %150, %1, %cst_53 {dimension_numbers = #tpu.dot_dimension_numbers<[1], [0], [0], [1], [0, 0, 1, 1], [], []>} : vector<16x32xbf16>, vector<32x128xbf16>, vector<16x128xf32> -> vector<16x128xf32>
    %152 = arith.truncf %122 : vector<16x32xf32> to vector<16x32xbf16>
    %cst_54 = arith.constant dense<0.000000e+00> : vector<16x128xf32>
    %153 = tpu.matmul %152, %2, %cst_54 {dimension_numbers = #tpu.dot_dimension_numbers<[1], [0], [0], [1], [0, 0, 1, 1], [], []>} : vector<16x32xbf16>, vector<32x128xbf16>, vector<16x128xf32> -> vector<16x128xf32>
    %154 = arith.addf %151, %153 : vector<16x128xf32>
    %155 = vector.broadcast %4 : vector<1x128xf32> to vector<16x128xf32>
    %156 = arith.addf %154, %155 : vector<16x128xf32>
    %157 = math.tanh %156 : vector<16x128xf32>
    %158 = vector.extract_strided_slice %157 {offsets = [0, 0], sizes = [16, 32], strides = [1, 1]} : vector<16x128xf32> to vector<16x32xf32>
    %cst_55 = arith.constant 5.000000e-01 : f32
    %159 = vector.broadcast %cst_55 : f32 to vector<16x32xf32>
    %160 = arith.mulf %159, %158 : vector<16x32xf32>
    %cst_56 = arith.constant 5.000000e-01 : f32
    %161 = vector.broadcast %cst_56 : f32 to vector<16x32xf32>
    %162 = arith.addf %160, %161 : vector<16x32xf32>
    %163 = vector.extract_strided_slice %157 {offsets = [0, 32], sizes = [16, 32], strides = [1, 1]} : vector<16x128xf32> to vector<16x32xf32>
    %cst_57 = arith.constant 5.000000e-01 : f32
    %164 = vector.broadcast %cst_57 : f32 to vector<16x32xf32>
    %165 = arith.mulf %164, %163 : vector<16x32xf32>
    %cst_58 = arith.constant 5.000000e-01 : f32
    %166 = vector.broadcast %cst_58 : f32 to vector<16x32xf32>
    %167 = arith.addf %165, %166 : vector<16x32xf32>
    %168 = vector.extract_strided_slice %157 {offsets = [0, 64], sizes = [16, 32], strides = [1, 1]} : vector<16x128xf32> to vector<16x32xf32>
    %169 = vector.extract_strided_slice %157 {offsets = [0, 96], sizes = [16, 32], strides = [1, 1]} : vector<16x128xf32> to vector<16x32xf32>
    %cst_59 = arith.constant 5.000000e-01 : f32
    %170 = vector.broadcast %cst_59 : f32 to vector<16x32xf32>
    %171 = arith.mulf %170, %169 : vector<16x32xf32>
    %cst_60 = arith.constant 5.000000e-01 : f32
    %172 = vector.broadcast %cst_60 : f32 to vector<16x32xf32>
    %173 = arith.addf %171, %172 : vector<16x32xf32>
    %174 = arith.mulf %167, %120 : vector<16x32xf32>
    %175 = arith.mulf %162, %168 : vector<16x32xf32>
    %176 = arith.addf %174, %175 : vector<16x32xf32>
    %177 = math.tanh %176 : vector<16x32xf32>
    %178 = arith.mulf %173, %177 : vector<16x32xf32>
    %c0_61 = arith.constant 0 : index
    %c48 = arith.constant 48 : index
    %c0_62 = arith.constant 0 : index
    %179 = vector.load %arg1[%c0_61, %c48, %c0_62] : memref<1x128x128xf32, #tpu.memory_space<vmem>>, vector<1x16x128xf32>
    %180 = vector.shape_cast %179 : vector<1x16x128xf32> to vector<16x128xf32>
    %181 = arith.truncf %149 : vector<16x32xf32> to vector<16x32xbf16>
    %cst_63 = arith.constant dense<0.000000e+00> : vector<16x128xf32>
    %182 = tpu.matmul %181, %0, %cst_63 {dimension_numbers = #tpu.dot_dimension_numbers<[1], [0], [0], [1], [0, 0, 1, 1], [], []>} : vector<16x32xbf16>, vector<32x128xbf16>, vector<16x128xf32> -> vector<16x128xf32>
    %183 = arith.addf %180, %182 : vector<16x128xf32>
    %184 = math.tanh %183 : vector<16x128xf32>
    %185 = vector.extract_strided_slice %184 {offsets = [0, 0], sizes = [16, 32], strides = [1, 1]} : vector<16x128xf32> to vector<16x32xf32>
    %cst_64 = arith.constant 5.000000e-01 : f32
    %186 = vector.broadcast %cst_64 : f32 to vector<16x32xf32>
    %187 = arith.mulf %186, %185 : vector<16x32xf32>
    %cst_65 = arith.constant 5.000000e-01 : f32
    %188 = vector.broadcast %cst_65 : f32 to vector<16x32xf32>
    %189 = arith.addf %187, %188 : vector<16x32xf32>
    %190 = vector.extract_strided_slice %184 {offsets = [0, 32], sizes = [16, 32], strides = [1, 1]} : vector<16x128xf32> to vector<16x32xf32>
    %cst_66 = arith.constant 5.000000e-01 : f32
    %191 = vector.broadcast %cst_66 : f32 to vector<16x32xf32>
    %192 = arith.mulf %191, %190 : vector<16x32xf32>
    %cst_67 = arith.constant 5.000000e-01 : f32
    %193 = vector.broadcast %cst_67 : f32 to vector<16x32xf32>
    %194 = arith.addf %192, %193 : vector<16x32xf32>
    %195 = vector.extract_strided_slice %184 {offsets = [0, 64], sizes = [16, 32], strides = [1, 1]} : vector<16x128xf32> to vector<16x32xf32>
    %196 = vector.extract_strided_slice %184 {offsets = [0, 96], sizes = [16, 32], strides = [1, 1]} : vector<16x128xf32> to vector<16x32xf32>
    %cst_68 = arith.constant 5.000000e-01 : f32
    %197 = vector.broadcast %cst_68 : f32 to vector<16x32xf32>
    %198 = arith.mulf %197, %196 : vector<16x32xf32>
    %cst_69 = arith.constant 5.000000e-01 : f32
    %199 = vector.broadcast %cst_69 : f32 to vector<16x32xf32>
    %200 = arith.addf %198, %199 : vector<16x32xf32>
    %201 = arith.mulf %194, %147 : vector<16x32xf32>
    %202 = arith.mulf %189, %195 : vector<16x32xf32>
    %203 = arith.addf %201, %202 : vector<16x32xf32>
    %204 = math.tanh %203 : vector<16x32xf32>
    %205 = arith.mulf %200, %204 : vector<16x32xf32>
    %206 = arith.truncf %205 : vector<16x32xf32> to vector<16x32xbf16>
    %cst_70 = arith.constant dense<0.000000e+00> : vector<16x128xf32>
    %207 = tpu.matmul %206, %1, %cst_70 {dimension_numbers = #tpu.dot_dimension_numbers<[1], [0], [0], [1], [0, 0, 1, 1], [], []>} : vector<16x32xbf16>, vector<32x128xbf16>, vector<16x128xf32> -> vector<16x128xf32>
    %208 = arith.truncf %178 : vector<16x32xf32> to vector<16x32xbf16>
    %cst_71 = arith.constant dense<0.000000e+00> : vector<16x128xf32>
    %209 = tpu.matmul %208, %2, %cst_71 {dimension_numbers = #tpu.dot_dimension_numbers<[1], [0], [0], [1], [0, 0, 1, 1], [], []>} : vector<16x32xbf16>, vector<32x128xbf16>, vector<16x128xf32> -> vector<16x128xf32>
    %210 = arith.addf %207, %209 : vector<16x128xf32>
    %211 = vector.broadcast %4 : vector<1x128xf32> to vector<16x128xf32>
    %212 = arith.addf %210, %211 : vector<16x128xf32>
    %213 = math.tanh %212 : vector<16x128xf32>
    %214 = vector.extract_strided_slice %213 {offsets = [0, 0], sizes = [16, 32], strides = [1, 1]} : vector<16x128xf32> to vector<16x32xf32>
    %cst_72 = arith.constant 5.000000e-01 : f32
    %215 = vector.broadcast %cst_72 : f32 to vector<16x32xf32>
    %216 = arith.mulf %215, %214 : vector<16x32xf32>
    %cst_73 = arith.constant 5.000000e-01 : f32
    %217 = vector.broadcast %cst_73 : f32 to vector<16x32xf32>
    %218 = arith.addf %216, %217 : vector<16x32xf32>
    %219 = vector.extract_strided_slice %213 {offsets = [0, 32], sizes = [16, 32], strides = [1, 1]} : vector<16x128xf32> to vector<16x32xf32>
    %cst_74 = arith.constant 5.000000e-01 : f32
    %220 = vector.broadcast %cst_74 : f32 to vector<16x32xf32>
    %221 = arith.mulf %220, %219 : vector<16x32xf32>
    %cst_75 = arith.constant 5.000000e-01 : f32
    %222 = vector.broadcast %cst_75 : f32 to vector<16x32xf32>
    %223 = arith.addf %221, %222 : vector<16x32xf32>
    %224 = vector.extract_strided_slice %213 {offsets = [0, 64], sizes = [16, 32], strides = [1, 1]} : vector<16x128xf32> to vector<16x32xf32>
    %225 = vector.extract_strided_slice %213 {offsets = [0, 96], sizes = [16, 32], strides = [1, 1]} : vector<16x128xf32> to vector<16x32xf32>
    %cst_76 = arith.constant 5.000000e-01 : f32
    %226 = vector.broadcast %cst_76 : f32 to vector<16x32xf32>
    %227 = arith.mulf %226, %225 : vector<16x32xf32>
    %cst_77 = arith.constant 5.000000e-01 : f32
    %228 = vector.broadcast %cst_77 : f32 to vector<16x32xf32>
    %229 = arith.addf %227, %228 : vector<16x32xf32>
    %230 = arith.mulf %223, %176 : vector<16x32xf32>
    %231 = arith.mulf %218, %224 : vector<16x32xf32>
    %232 = arith.addf %230, %231 : vector<16x32xf32>
    %233 = math.tanh %232 : vector<16x32xf32>
    %234 = arith.mulf %229, %233 : vector<16x32xf32>
    %c0_78 = arith.constant 0 : index
    %c64_79 = arith.constant 64 : index
    %c0_80 = arith.constant 0 : index
    %235 = vector.load %arg1[%c0_78, %c64_79, %c0_80] : memref<1x128x128xf32, #tpu.memory_space<vmem>>, vector<1x16x128xf32>
    %236 = vector.shape_cast %235 : vector<1x16x128xf32> to vector<16x128xf32>
    %237 = arith.truncf %205 : vector<16x32xf32> to vector<16x32xbf16>
    %cst_81 = arith.constant dense<0.000000e+00> : vector<16x128xf32>
    %238 = tpu.matmul %237, %0, %cst_81 {dimension_numbers = #tpu.dot_dimension_numbers<[1], [0], [0], [1], [0, 0, 1, 1], [], []>} : vector<16x32xbf16>, vector<32x128xbf16>, vector<16x128xf32> -> vector<16x128xf32>
    %239 = arith.addf %236, %238 : vector<16x128xf32>
    %240 = math.tanh %239 : vector<16x128xf32>
    %241 = vector.extract_strided_slice %240 {offsets = [0, 0], sizes = [16, 32], strides = [1, 1]} : vector<16x128xf32> to vector<16x32xf32>
    %cst_82 = arith.constant 5.000000e-01 : f32
    %242 = vector.broadcast %cst_82 : f32 to vector<16x32xf32>
    %243 = arith.mulf %242, %241 : vector<16x32xf32>
    %cst_83 = arith.constant 5.000000e-01 : f32
    %244 = vector.broadcast %cst_83 : f32 to vector<16x32xf32>
    %245 = arith.addf %243, %244 : vector<16x32xf32>
    %246 = vector.extract_strided_slice %240 {offsets = [0, 32], sizes = [16, 32], strides = [1, 1]} : vector<16x128xf32> to vector<16x32xf32>
    %cst_84 = arith.constant 5.000000e-01 : f32
    %247 = vector.broadcast %cst_84 : f32 to vector<16x32xf32>
    %248 = arith.mulf %247, %246 : vector<16x32xf32>
    %cst_85 = arith.constant 5.000000e-01 : f32
    %249 = vector.broadcast %cst_85 : f32 to vector<16x32xf32>
    %250 = arith.addf %248, %249 : vector<16x32xf32>
    %251 = vector.extract_strided_slice %240 {offsets = [0, 64], sizes = [16, 32], strides = [1, 1]} : vector<16x128xf32> to vector<16x32xf32>
    %252 = vector.extract_strided_slice %240 {offsets = [0, 96], sizes = [16, 32], strides = [1, 1]} : vector<16x128xf32> to vector<16x32xf32>
    %cst_86 = arith.constant 5.000000e-01 : f32
    %253 = vector.broadcast %cst_86 : f32 to vector<16x32xf32>
    %254 = arith.mulf %253, %252 : vector<16x32xf32>
    %cst_87 = arith.constant 5.000000e-01 : f32
    %255 = vector.broadcast %cst_87 : f32 to vector<16x32xf32>
    %256 = arith.addf %254, %255 : vector<16x32xf32>
    %257 = arith.mulf %250, %203 : vector<16x32xf32>
    %258 = arith.mulf %245, %251 : vector<16x32xf32>
    %259 = arith.addf %257, %258 : vector<16x32xf32>
    %260 = math.tanh %259 : vector<16x32xf32>
    %261 = arith.mulf %256, %260 : vector<16x32xf32>
    %262 = arith.truncf %261 : vector<16x32xf32> to vector<16x32xbf16>
    %cst_88 = arith.constant dense<0.000000e+00> : vector<16x128xf32>
    %263 = tpu.matmul %262, %1, %cst_88 {dimension_numbers = #tpu.dot_dimension_numbers<[1], [0], [0], [1], [0, 0, 1, 1], [], []>} : vector<16x32xbf16>, vector<32x128xbf16>, vector<16x128xf32> -> vector<16x128xf32>
    %264 = arith.truncf %234 : vector<16x32xf32> to vector<16x32xbf16>
    %cst_89 = arith.constant dense<0.000000e+00> : vector<16x128xf32>
    %265 = tpu.matmul %264, %2, %cst_89 {dimension_numbers = #tpu.dot_dimension_numbers<[1], [0], [0], [1], [0, 0, 1, 1], [], []>} : vector<16x32xbf16>, vector<32x128xbf16>, vector<16x128xf32> -> vector<16x128xf32>
    %266 = arith.addf %263, %265 : vector<16x128xf32>
    %267 = vector.broadcast %4 : vector<1x128xf32> to vector<16x128xf32>
    %268 = arith.addf %266, %267 : vector<16x128xf32>
    %269 = math.tanh %268 : vector<16x128xf32>
    %270 = vector.extract_strided_slice %269 {offsets = [0, 0], sizes = [16, 32], strides = [1, 1]} : vector<16x128xf32> to vector<16x32xf32>
    %cst_90 = arith.constant 5.000000e-01 : f32
    %271 = vector.broadcast %cst_90 : f32 to vector<16x32xf32>
    %272 = arith.mulf %271, %270 : vector<16x32xf32>
    %cst_91 = arith.constant 5.000000e-01 : f32
    %273 = vector.broadcast %cst_91 : f32 to vector<16x32xf32>
    %274 = arith.addf %272, %273 : vector<16x32xf32>
    %275 = vector.extract_strided_slice %269 {offsets = [0, 32], sizes = [16, 32], strides = [1, 1]} : vector<16x128xf32> to vector<16x32xf32>
    %cst_92 = arith.constant 5.000000e-01 : f32
    %276 = vector.broadcast %cst_92 : f32 to vector<16x32xf32>
    %277 = arith.mulf %276, %275 : vector<16x32xf32>
    %cst_93 = arith.constant 5.000000e-01 : f32
    %278 = vector.broadcast %cst_93 : f32 to vector<16x32xf32>
    %279 = arith.addf %277, %278 : vector<16x32xf32>
    %280 = vector.extract_strided_slice %269 {offsets = [0, 64], sizes = [16, 32], strides = [1, 1]} : vector<16x128xf32> to vector<16x32xf32>
    %281 = vector.extract_strided_slice %269 {offsets = [0, 96], sizes = [16, 32], strides = [1, 1]} : vector<16x128xf32> to vector<16x32xf32>
    %cst_94 = arith.constant 5.000000e-01 : f32
    %282 = vector.broadcast %cst_94 : f32 to vector<16x32xf32>
    %283 = arith.mulf %282, %281 : vector<16x32xf32>
    %cst_95 = arith.constant 5.000000e-01 : f32
    %284 = vector.broadcast %cst_95 : f32 to vector<16x32xf32>
    %285 = arith.addf %283, %284 : vector<16x32xf32>
    %286 = arith.mulf %279, %232 : vector<16x32xf32>
    %287 = arith.mulf %274, %280 : vector<16x32xf32>
    %288 = arith.addf %286, %287 : vector<16x32xf32>
    %289 = math.tanh %288 : vector<16x32xf32>
    %290 = arith.mulf %285, %289 : vector<16x32xf32>
    %c0_96 = arith.constant 0 : index
    %c80 = arith.constant 80 : index
    %c0_97 = arith.constant 0 : index
    %291 = vector.load %arg1[%c0_96, %c80, %c0_97] : memref<1x128x128xf32, #tpu.memory_space<vmem>>, vector<1x16x128xf32>
    %292 = vector.shape_cast %291 : vector<1x16x128xf32> to vector<16x128xf32>
    %293 = arith.truncf %261 : vector<16x32xf32> to vector<16x32xbf16>
    %cst_98 = arith.constant dense<0.000000e+00> : vector<16x128xf32>
    %294 = tpu.matmul %293, %0, %cst_98 {dimension_numbers = #tpu.dot_dimension_numbers<[1], [0], [0], [1], [0, 0, 1, 1], [], []>} : vector<16x32xbf16>, vector<32x128xbf16>, vector<16x128xf32> -> vector<16x128xf32>
    %295 = arith.addf %292, %294 : vector<16x128xf32>
    %296 = math.tanh %295 : vector<16x128xf32>
    %297 = vector.extract_strided_slice %296 {offsets = [0, 0], sizes = [16, 32], strides = [1, 1]} : vector<16x128xf32> to vector<16x32xf32>
    %cst_99 = arith.constant 5.000000e-01 : f32
    %298 = vector.broadcast %cst_99 : f32 to vector<16x32xf32>
    %299 = arith.mulf %298, %297 : vector<16x32xf32>
    %cst_100 = arith.constant 5.000000e-01 : f32
    %300 = vector.broadcast %cst_100 : f32 to vector<16x32xf32>
    %301 = arith.addf %299, %300 : vector<16x32xf32>
    %302 = vector.extract_strided_slice %296 {offsets = [0, 32], sizes = [16, 32], strides = [1, 1]} : vector<16x128xf32> to vector<16x32xf32>
    %cst_101 = arith.constant 5.000000e-01 : f32
    %303 = vector.broadcast %cst_101 : f32 to vector<16x32xf32>
    %304 = arith.mulf %303, %302 : vector<16x32xf32>
    %cst_102 = arith.constant 5.000000e-01 : f32
    %305 = vector.broadcast %cst_102 : f32 to vector<16x32xf32>
    %306 = arith.addf %304, %305 : vector<16x32xf32>
    %307 = vector.extract_strided_slice %296 {offsets = [0, 64], sizes = [16, 32], strides = [1, 1]} : vector<16x128xf32> to vector<16x32xf32>
    %308 = vector.extract_strided_slice %296 {offsets = [0, 96], sizes = [16, 32], strides = [1, 1]} : vector<16x128xf32> to vector<16x32xf32>
    %cst_103 = arith.constant 5.000000e-01 : f32
    %309 = vector.broadcast %cst_103 : f32 to vector<16x32xf32>
    %310 = arith.mulf %309, %308 : vector<16x32xf32>
    %cst_104 = arith.constant 5.000000e-01 : f32
    %311 = vector.broadcast %cst_104 : f32 to vector<16x32xf32>
    %312 = arith.addf %310, %311 : vector<16x32xf32>
    %313 = arith.mulf %306, %259 : vector<16x32xf32>
    %314 = arith.mulf %301, %307 : vector<16x32xf32>
    %315 = arith.addf %313, %314 : vector<16x32xf32>
    %316 = math.tanh %315 : vector<16x32xf32>
    %317 = arith.mulf %312, %316 : vector<16x32xf32>
    %318 = arith.truncf %317 : vector<16x32xf32> to vector<16x32xbf16>
    %cst_105 = arith.constant dense<0.000000e+00> : vector<16x128xf32>
    %319 = tpu.matmul %318, %1, %cst_105 {dimension_numbers = #tpu.dot_dimension_numbers<[1], [0], [0], [1], [0, 0, 1, 1], [], []>} : vector<16x32xbf16>, vector<32x128xbf16>, vector<16x128xf32> -> vector<16x128xf32>
    %320 = arith.truncf %290 : vector<16x32xf32> to vector<16x32xbf16>
    %cst_106 = arith.constant dense<0.000000e+00> : vector<16x128xf32>
    %321 = tpu.matmul %320, %2, %cst_106 {dimension_numbers = #tpu.dot_dimension_numbers<[1], [0], [0], [1], [0, 0, 1, 1], [], []>} : vector<16x32xbf16>, vector<32x128xbf16>, vector<16x128xf32> -> vector<16x128xf32>
    %322 = arith.addf %319, %321 : vector<16x128xf32>
    %323 = vector.broadcast %4 : vector<1x128xf32> to vector<16x128xf32>
    %324 = arith.addf %322, %323 : vector<16x128xf32>
    %325 = math.tanh %324 : vector<16x128xf32>
    %326 = vector.extract_strided_slice %325 {offsets = [0, 0], sizes = [16, 32], strides = [1, 1]} : vector<16x128xf32> to vector<16x32xf32>
    %cst_107 = arith.constant 5.000000e-01 : f32
    %327 = vector.broadcast %cst_107 : f32 to vector<16x32xf32>
    %328 = arith.mulf %327, %326 : vector<16x32xf32>
    %cst_108 = arith.constant 5.000000e-01 : f32
    %329 = vector.broadcast %cst_108 : f32 to vector<16x32xf32>
    %330 = arith.addf %328, %329 : vector<16x32xf32>
    %331 = vector.extract_strided_slice %325 {offsets = [0, 32], sizes = [16, 32], strides = [1, 1]} : vector<16x128xf32> to vector<16x32xf32>
    %cst_109 = arith.constant 5.000000e-01 : f32
    %332 = vector.broadcast %cst_109 : f32 to vector<16x32xf32>
    %333 = arith.mulf %332, %331 : vector<16x32xf32>
    %cst_110 = arith.constant 5.000000e-01 : f32
    %334 = vector.broadcast %cst_110 : f32 to vector<16x32xf32>
    %335 = arith.addf %333, %334 : vector<16x32xf32>
    %336 = vector.extract_strided_slice %325 {offsets = [0, 64], sizes = [16, 32], strides = [1, 1]} : vector<16x128xf32> to vector<16x32xf32>
    %337 = vector.extract_strided_slice %325 {offsets = [0, 96], sizes = [16, 32], strides = [1, 1]} : vector<16x128xf32> to vector<16x32xf32>
    %cst_111 = arith.constant 5.000000e-01 : f32
    %338 = vector.broadcast %cst_111 : f32 to vector<16x32xf32>
    %339 = arith.mulf %338, %337 : vector<16x32xf32>
    %cst_112 = arith.constant 5.000000e-01 : f32
    %340 = vector.broadcast %cst_112 : f32 to vector<16x32xf32>
    %341 = arith.addf %339, %340 : vector<16x32xf32>
    %342 = arith.mulf %335, %288 : vector<16x32xf32>
    %343 = arith.mulf %330, %336 : vector<16x32xf32>
    %344 = arith.addf %342, %343 : vector<16x32xf32>
    %345 = math.tanh %344 : vector<16x32xf32>
    %346 = arith.mulf %341, %345 : vector<16x32xf32>
    %c0_113 = arith.constant 0 : index
    %c96_114 = arith.constant 96 : index
    %c0_115 = arith.constant 0 : index
    %347 = vector.load %arg1[%c0_113, %c96_114, %c0_115] : memref<1x128x128xf32, #tpu.memory_space<vmem>>, vector<1x16x128xf32>
    %348 = vector.shape_cast %347 : vector<1x16x128xf32> to vector<16x128xf32>
    %349 = arith.truncf %317 : vector<16x32xf32> to vector<16x32xbf16>
    %cst_116 = arith.constant dense<0.000000e+00> : vector<16x128xf32>
    %350 = tpu.matmul %349, %0, %cst_116 {dimension_numbers = #tpu.dot_dimension_numbers<[1], [0], [0], [1], [0, 0, 1, 1], [], []>} : vector<16x32xbf16>, vector<32x128xbf16>, vector<16x128xf32> -> vector<16x128xf32>
    %351 = arith.addf %348, %350 : vector<16x128xf32>
    %352 = math.tanh %351 : vector<16x128xf32>
    %353 = vector.extract_strided_slice %352 {offsets = [0, 0], sizes = [16, 32], strides = [1, 1]} : vector<16x128xf32> to vector<16x32xf32>
    %cst_117 = arith.constant 5.000000e-01 : f32
    %354 = vector.broadcast %cst_117 : f32 to vector<16x32xf32>
    %355 = arith.mulf %354, %353 : vector<16x32xf32>
    %cst_118 = arith.constant 5.000000e-01 : f32
    %356 = vector.broadcast %cst_118 : f32 to vector<16x32xf32>
    %357 = arith.addf %355, %356 : vector<16x32xf32>
    %358 = vector.extract_strided_slice %352 {offsets = [0, 32], sizes = [16, 32], strides = [1, 1]} : vector<16x128xf32> to vector<16x32xf32>
    %cst_119 = arith.constant 5.000000e-01 : f32
    %359 = vector.broadcast %cst_119 : f32 to vector<16x32xf32>
    %360 = arith.mulf %359, %358 : vector<16x32xf32>
    %cst_120 = arith.constant 5.000000e-01 : f32
    %361 = vector.broadcast %cst_120 : f32 to vector<16x32xf32>
    %362 = arith.addf %360, %361 : vector<16x32xf32>
    %363 = vector.extract_strided_slice %352 {offsets = [0, 64], sizes = [16, 32], strides = [1, 1]} : vector<16x128xf32> to vector<16x32xf32>
    %364 = vector.extract_strided_slice %352 {offsets = [0, 96], sizes = [16, 32], strides = [1, 1]} : vector<16x128xf32> to vector<16x32xf32>
    %cst_121 = arith.constant 5.000000e-01 : f32
    %365 = vector.broadcast %cst_121 : f32 to vector<16x32xf32>
    %366 = arith.mulf %365, %364 : vector<16x32xf32>
    %cst_122 = arith.constant 5.000000e-01 : f32
    %367 = vector.broadcast %cst_122 : f32 to vector<16x32xf32>
    %368 = arith.addf %366, %367 : vector<16x32xf32>
    %369 = arith.mulf %362, %315 : vector<16x32xf32>
    %370 = arith.mulf %357, %363 : vector<16x32xf32>
    %371 = arith.addf %369, %370 : vector<16x32xf32>
    %372 = math.tanh %371 : vector<16x32xf32>
    %373 = arith.mulf %368, %372 : vector<16x32xf32>
    %374 = arith.truncf %373 : vector<16x32xf32> to vector<16x32xbf16>
    %cst_123 = arith.constant dense<0.000000e+00> : vector<16x128xf32>
    %375 = tpu.matmul %374, %1, %cst_123 {dimension_numbers = #tpu.dot_dimension_numbers<[1], [0], [0], [1], [0, 0, 1, 1], [], []>} : vector<16x32xbf16>, vector<32x128xbf16>, vector<16x128xf32> -> vector<16x128xf32>
    %376 = arith.truncf %346 : vector<16x32xf32> to vector<16x32xbf16>
    %cst_124 = arith.constant dense<0.000000e+00> : vector<16x128xf32>
    %377 = tpu.matmul %376, %2, %cst_124 {dimension_numbers = #tpu.dot_dimension_numbers<[1], [0], [0], [1], [0, 0, 1, 1], [], []>} : vector<16x32xbf16>, vector<32x128xbf16>, vector<16x128xf32> -> vector<16x128xf32>
    %378 = arith.addf %375, %377 : vector<16x128xf32>
    %379 = vector.broadcast %4 : vector<1x128xf32> to vector<16x128xf32>
    %380 = arith.addf %378, %379 : vector<16x128xf32>
    %381 = math.tanh %380 : vector<16x128xf32>
    %382 = vector.extract_strided_slice %381 {offsets = [0, 0], sizes = [16, 32], strides = [1, 1]} : vector<16x128xf32> to vector<16x32xf32>
    %cst_125 = arith.constant 5.000000e-01 : f32
    %383 = vector.broadcast %cst_125 : f32 to vector<16x32xf32>
    %384 = arith.mulf %383, %382 : vector<16x32xf32>
    %cst_126 = arith.constant 5.000000e-01 : f32
    %385 = vector.broadcast %cst_126 : f32 to vector<16x32xf32>
    %386 = arith.addf %384, %385 : vector<16x32xf32>
    %387 = vector.extract_strided_slice %381 {offsets = [0, 32], sizes = [16, 32], strides = [1, 1]} : vector<16x128xf32> to vector<16x32xf32>
    %cst_127 = arith.constant 5.000000e-01 : f32
    %388 = vector.broadcast %cst_127 : f32 to vector<16x32xf32>
    %389 = arith.mulf %388, %387 : vector<16x32xf32>
    %cst_128 = arith.constant 5.000000e-01 : f32
    %390 = vector.broadcast %cst_128 : f32 to vector<16x32xf32>
    %391 = arith.addf %389, %390 : vector<16x32xf32>
    %392 = vector.extract_strided_slice %381 {offsets = [0, 64], sizes = [16, 32], strides = [1, 1]} : vector<16x128xf32> to vector<16x32xf32>
    %393 = vector.extract_strided_slice %381 {offsets = [0, 96], sizes = [16, 32], strides = [1, 1]} : vector<16x128xf32> to vector<16x32xf32>
    %cst_129 = arith.constant 5.000000e-01 : f32
    %394 = vector.broadcast %cst_129 : f32 to vector<16x32xf32>
    %395 = arith.mulf %394, %393 : vector<16x32xf32>
    %cst_130 = arith.constant 5.000000e-01 : f32
    %396 = vector.broadcast %cst_130 : f32 to vector<16x32xf32>
    %397 = arith.addf %395, %396 : vector<16x32xf32>
    %398 = arith.mulf %391, %344 : vector<16x32xf32>
    %399 = arith.mulf %386, %392 : vector<16x32xf32>
    %400 = arith.addf %398, %399 : vector<16x32xf32>
    %401 = math.tanh %400 : vector<16x32xf32>
    %402 = arith.mulf %397, %401 : vector<16x32xf32>
    %c0_131 = arith.constant 0 : index
    %c112 = arith.constant 112 : index
    %c0_132 = arith.constant 0 : index
    %403 = vector.load %arg1[%c0_131, %c112, %c0_132] : memref<1x128x128xf32, #tpu.memory_space<vmem>>, vector<1x16x128xf32>
    %404 = vector.shape_cast %403 : vector<1x16x128xf32> to vector<16x128xf32>
    %405 = arith.truncf %373 : vector<16x32xf32> to vector<16x32xbf16>
    %cst_133 = arith.constant dense<0.000000e+00> : vector<16x128xf32>
    %406 = tpu.matmul %405, %0, %cst_133 {dimension_numbers = #tpu.dot_dimension_numbers<[1], [0], [0], [1], [0, 0, 1, 1], [], []>} : vector<16x32xbf16>, vector<32x128xbf16>, vector<16x128xf32> -> vector<16x128xf32>
    %407 = arith.addf %404, %406 : vector<16x128xf32>
    %408 = math.tanh %407 : vector<16x128xf32>
    %409 = vector.extract_strided_slice %408 {offsets = [0, 0], sizes = [16, 32], strides = [1, 1]} : vector<16x128xf32> to vector<16x32xf32>
    %cst_134 = arith.constant 5.000000e-01 : f32
    %410 = vector.broadcast %cst_134 : f32 to vector<16x32xf32>
    %411 = arith.mulf %410, %409 : vector<16x32xf32>
    %cst_135 = arith.constant 5.000000e-01 : f32
    %412 = vector.broadcast %cst_135 : f32 to vector<16x32xf32>
    %413 = arith.addf %411, %412 : vector<16x32xf32>
    %414 = vector.extract_strided_slice %408 {offsets = [0, 32], sizes = [16, 32], strides = [1, 1]} : vector<16x128xf32> to vector<16x32xf32>
    %cst_136 = arith.constant 5.000000e-01 : f32
    %415 = vector.broadcast %cst_136 : f32 to vector<16x32xf32>
    %416 = arith.mulf %415, %414 : vector<16x32xf32>
    %cst_137 = arith.constant 5.000000e-01 : f32
    %417 = vector.broadcast %cst_137 : f32 to vector<16x32xf32>
    %418 = arith.addf %416, %417 : vector<16x32xf32>
    %419 = vector.extract_strided_slice %408 {offsets = [0, 64], sizes = [16, 32], strides = [1, 1]} : vector<16x128xf32> to vector<16x32xf32>
    %420 = vector.extract_strided_slice %408 {offsets = [0, 96], sizes = [16, 32], strides = [1, 1]} : vector<16x128xf32> to vector<16x32xf32>
    %cst_138 = arith.constant 5.000000e-01 : f32
    %421 = vector.broadcast %cst_138 : f32 to vector<16x32xf32>
    %422 = arith.mulf %421, %420 : vector<16x32xf32>
    %cst_139 = arith.constant 5.000000e-01 : f32
    %423 = vector.broadcast %cst_139 : f32 to vector<16x32xf32>
    %424 = arith.addf %422, %423 : vector<16x32xf32>
    %425 = arith.mulf %418, %371 : vector<16x32xf32>
    %426 = arith.mulf %413, %419 : vector<16x32xf32>
    %427 = arith.addf %425, %426 : vector<16x32xf32>
    %428 = math.tanh %427 : vector<16x32xf32>
    %429 = arith.mulf %424, %428 : vector<16x32xf32>
    %430 = arith.truncf %429 : vector<16x32xf32> to vector<16x32xbf16>
    %cst_140 = arith.constant dense<0.000000e+00> : vector<16x128xf32>
    %431 = tpu.matmul %430, %1, %cst_140 {dimension_numbers = #tpu.dot_dimension_numbers<[1], [0], [0], [1], [0, 0, 1, 1], [], []>} : vector<16x32xbf16>, vector<32x128xbf16>, vector<16x128xf32> -> vector<16x128xf32>
    %432 = arith.truncf %402 : vector<16x32xf32> to vector<16x32xbf16>
    %cst_141 = arith.constant dense<0.000000e+00> : vector<16x128xf32>
    %433 = tpu.matmul %432, %2, %cst_141 {dimension_numbers = #tpu.dot_dimension_numbers<[1], [0], [0], [1], [0, 0, 1, 1], [], []>} : vector<16x32xbf16>, vector<32x128xbf16>, vector<16x128xf32> -> vector<16x128xf32>
    %434 = arith.addf %431, %433 : vector<16x128xf32>
    %435 = vector.broadcast %4 : vector<1x128xf32> to vector<16x128xf32>
    %436 = arith.addf %434, %435 : vector<16x128xf32>
    %437 = math.tanh %436 : vector<16x128xf32>
    %438 = vector.extract_strided_slice %437 {offsets = [0, 0], sizes = [16, 32], strides = [1, 1]} : vector<16x128xf32> to vector<16x32xf32>
    %cst_142 = arith.constant 5.000000e-01 : f32
    %439 = vector.broadcast %cst_142 : f32 to vector<16x32xf32>
    %440 = arith.mulf %439, %438 : vector<16x32xf32>
    %cst_143 = arith.constant 5.000000e-01 : f32
    %441 = vector.broadcast %cst_143 : f32 to vector<16x32xf32>
    %442 = arith.addf %440, %441 : vector<16x32xf32>
    %443 = vector.extract_strided_slice %437 {offsets = [0, 32], sizes = [16, 32], strides = [1, 1]} : vector<16x128xf32> to vector<16x32xf32>
    %cst_144 = arith.constant 5.000000e-01 : f32
    %444 = vector.broadcast %cst_144 : f32 to vector<16x32xf32>
    %445 = arith.mulf %444, %443 : vector<16x32xf32>
    %cst_145 = arith.constant 5.000000e-01 : f32
    %446 = vector.broadcast %cst_145 : f32 to vector<16x32xf32>
    %447 = arith.addf %445, %446 : vector<16x32xf32>
    %448 = vector.extract_strided_slice %437 {offsets = [0, 64], sizes = [16, 32], strides = [1, 1]} : vector<16x128xf32> to vector<16x32xf32>
    %449 = vector.extract_strided_slice %437 {offsets = [0, 96], sizes = [16, 32], strides = [1, 1]} : vector<16x128xf32> to vector<16x32xf32>
    %cst_146 = arith.constant 5.000000e-01 : f32
    %450 = vector.broadcast %cst_146 : f32 to vector<16x32xf32>
    %451 = arith.mulf %450, %449 : vector<16x32xf32>
    %cst_147 = arith.constant 5.000000e-01 : f32
    %452 = vector.broadcast %cst_147 : f32 to vector<16x32xf32>
    %453 = arith.addf %451, %452 : vector<16x32xf32>
    %454 = arith.mulf %447, %400 : vector<16x32xf32>
    %455 = arith.mulf %442, %448 : vector<16x32xf32>
    %456 = arith.addf %454, %455 : vector<16x32xf32>
    %457 = math.tanh %456 : vector<16x32xf32>
    %458 = arith.mulf %453, %457 : vector<16x32xf32>
    %459 = tpu.concatenate %429, %458, %427, %456 in 1 : vector<16x32xf32>, vector<16x32xf32>, vector<16x32xf32>, vector<16x32xf32> -> vector<16x128xf32>
    %c0_148 = arith.constant 0 : index
    %c0_149 = arith.constant 0 : index
    %460 = vector.load %arg6[%c0_148, %c0_149] : memref<16x128xf32, #tpu.memory_space<vmem>>, vector<16x128xf32>
    tpu.vector_store %arg6[%c0_148, %c0_149], %459 {strides = array<i32>} : memref<16x128xf32, #tpu.memory_space<vmem>>, vector<16x128xf32>,
    %461 = arith.truncf %458 : vector<16x32xf32> to vector<16x32xbf16>
    %cst_150 = arith.constant dense<0.000000e+00> : vector<16x128xf32>
    %462 = tpu.matmul %461, %3, %cst_150 {dimension_numbers = #tpu.dot_dimension_numbers<[1], [0], [0], [1], [0, 0, 1, 1], [], []>} : vector<16x32xbf16>, vector<32x128xbf16>, vector<16x128xf32> -> vector<16x128xf32>
    %463 = vector.broadcast %5 : vector<1x128xf32> to vector<16x128xf32>
    %464 = arith.addf %462, %463 : vector<16x128xf32>
    %465 = arith.negf %464 : vector<16x128xf32>
    %466 = math.exp %465 : vector<16x128xf32>
    %cst_151 = arith.constant 1.000000e+00 : f32
    %467 = vector.broadcast %cst_151 : f32 to vector<16x128xf32>
    %468 = arith.addf %467, %466 : vector<16x128xf32>
    %469 = arith.divf %467, %468 : vector<16x128xf32>
    %c0_152 = arith.constant 0 : index
    %c0_153 = arith.constant 0 : index
    %470 = vector.load %arg5[%c0_152, %c0_153] : memref<16x128xf32, #tpu.memory_space<vmem>>, vector<16x128xf32>
    tpu.vector_store %arg5[%c0_152, %c0_153], %469 {strides = array<i32>} : memref<16x128xf32, #tpu.memory_space<vmem>>, vector<16x128xf32>,
    return
  }
  func.func @transform_0(%arg0: i32) -> (i32, i32, i32) {
    %c0_i32 = arith.constant 0 : i32
    %c0_i32_0 = arith.constant 0 : i32
    %c0_i32_1 = arith.constant 0 : i32
    return %arg0, %c0_i32, %c0_i32_0 : i32, i32, i32
  }
  func.func @transform_1(%arg0: i32) -> (i32, i32) {
    %c0_i32 = arith.constant 0 : i32
    %c0_i32_0 = arith.constant 0 : i32
    return %arg0, %c0_i32 : i32, i32
  }
  func.func @transform_2(%arg0: i32) -> (i32, i32) {
    %c0_i32 = arith.constant 0 : i32
    %c0_i32_0 = arith.constant 0 : i32
    %c0_i32_1 = arith.constant 0 : i32
    return %c0_i32, %c0_i32_0 : i32, i32
  }
  func.func @transform_3(%arg0: i32) -> (i32, i32) {
    %c0_i32 = arith.constant 0 : i32
    %c0_i32_0 = arith.constant 0 : i32
    %c0_i32_1 = arith.constant 0 : i32
    return %c0_i32, %c0_i32_0 : i32, i32
  }
  func.func @transform_4(%arg0: i32) -> (i32, i32) {
    %c0_i32 = arith.constant 0 : i32
    %c0_i32_0 = arith.constant 0 : i32
    return %arg0, %c0_i32 : i32, i32
  }
  func.func @transform_5(%arg0: i32) -> (i32, i32) {
    %c0_i32 = arith.constant 0 : i32
    %c0_i32_0 = arith.constant 0 : i32
    return %arg0, %c0_i32 : i32, i32
  }
}

</mosaic_0001>

<bundles_post_ra>
// kernel: mul.33
= control target key start
LH: loop header
LB: loop body
LE: loop exit
PB: predicated region body
PF: predicated region fallthrough
CT: control target
= control target key end

     0   :  { %s34_s0 = inlined_call_operand.vmem [shape: f32[1,128], index: 0, kind: input, shape index: {}]   ;;  %s35_s1 = inlined_call_operand.vmem [shape: f32[1,128], index: 1, kind: input, shape index: {}]   ;;  %s36_s2 = inlined_call_operand.vmem [shape: f32[1,128], index: 2, kind: output, shape index: {}]  }
   0x1   :  { %v3_v0 = vld [vmem:[%s34_s0] sm:$0x1] }
   0x2   :  { %v4_v1 = vld [vmem:[%s35_s1] sm:$0x1] }
   0x3   :  { %v7_v2 = vmul.f32 %v4_v1, %v3_v0 }
   0x5   :  { %9 = vst [vmem:[%s36_s2] sm:$0x1] %v7_v2 }

// kernel: sentiment_lstm_forward.1
= control target key start
LH: loop header
LB: loop body
LE: loop exit
PB: predicated region body
PF: predicated region fallthrough
CT: control target
= control target key end

     0   :  { %v2478_v0 = vmov 0.0   ;;  %vm2479_vm0 = vmmov 0   ;;  %vm55_vm1 = vcmask 261120   ;;  %s2480_s26 = smov 96   ;;  %s2481_s30 = smov 64   ;;  %vm1916_vm2 = vcmask 523264   ;;  %s3108_s2 = inlined_call_operand.vmem [shape: bf16[128,128], index: 2, kind: input, shape index: {}]   ;;  %s3109_s1 = inlined_call_operand.vmem [shape: f32[16,128], index: 1, kind: input, shape index: {}]   ;;  %s3110_s0 = inlined_call_operand.vmem [shape: f32[1,128,128], index: 0, kind: input, shape index: {}]   ;;  %s3111_s3 = inlined_call_operand.vmem [shape: f32[2,128], index: 3, kind: input, shape index: {}]   ;;  %s3112_s5 = inlined_call_operand.vmem [shape: f32[16,128], index: 5, kind: output, shape index: {1}]   ;;  %s3113_s4 = inlined_call_operand.vmem [shape: f32[16,128], index: 4, kind: output, shape index: {0}]  }
   0x1   :  { %2122 = vmatprep.subr.bf16.mxu0 %v2478_v0  ;;  %v2517_v1 = vld [vmem:[%s3108_s2 + $0x8] sm:$0xff]   ;;  %2126 = vmatprep.mubr.msk.bf16.mxu0 %vm2479_vm0, %v2478_v0  ;;  %v2528_v2 = vld [vmem:[%s3108_s2] sm:$0xff]   ;;  %s2482_s6 = smov 32   ;;  %v2576_v33 = vld [vmem:[%s3108_s2 + $0x18] sm:$0xff]   ;;  %vm1919_vm3 = vcmask 785408  }
   0x2   :  { %2130 = vmatprep.subr.bf16.mxu1 %v2478_v0  ;;  %2134 = vmatprep.mubr.msk.bf16.mxu1 %vm2479_vm0, %v2478_v0  ;;  %v2533_v3 = vld [vmem:[%s3109_s1] sm:$0xff]  ;;  %v2538_v4 = vld [vmem:[%s3109_s1 + $0x8] sm:$0xff]  ;;  %v2588_v35 = vld [vmem:[%s3108_s2 + $0x10] sm:$0xff]  }
   0x3   :  { %2123 = vmatpush3.bf16.msra.mxu0 %v2517_v1  ;;  %110 = vrot.lane.b32.xlu1 %v2533_v3, %s2480_s26  ;;  %v42_v5 = vpack.c.bf16 %v2538_v4, %v2533_v3  ;;  %v40_v6 = vld [vmem:[%s3110_s0] sm:$0xff]  ;;  %v41_v10 = vld [vmem:[%s3110_s0 + $0x8] sm:$0xff]  ;;  %v321_v53 = vld [vmem:[%s3110_s0 + $0x10] sm:$0xff] }
   0x4   :  { %2124 = vmatprep.subr.bf16.mxu0 %v2478_v0  ;;  %v2571_v32 = vld [vmem:[%s3108_s2 + $0x28] sm:$0xff]   ;;  %v2582_v34 = vld [vmem:[%s3108_s2 + $0x20] sm:$0xff]   ;;  %v322_v61 = vld [vmem:[%s3110_s0 + $0x18] sm:$0xff] }
   0x5   :  { %2131 = vmatpush3.bf16.msra.mxu1 %v2571_v32  ;;  %v2624_v49 = vld [vmem:[%s3111_s3] ss:$0 sm:$0xff] }
   0x6   :  { %2132 = vmatprep.subr.bf16.mxu1 %v2478_v0 }
   0x7   :  { %2125 = vmatpush3.bf16.msra.mxu0 %v2528_v2  ;;  %112 = vrot.lane.b32.xlu1 %v2538_v4, %s2480_s26 }
   0x8   :  { %2138 = vmatprep.subr.bf16.mxu0 %v2478_v0 }
   0x9   :  { %2133 = vmatpush3.bf16.msra.mxu1 %v2582_v34 }
   0xa   :  { %2127 = vmatmul.mubr.msk.bf16.vlgmr.msra.gmra.mxu0 %vm55_vm1, %v42_v5  ;;  %2146 = vmatprep.subr.bf16.mxu1 %v2478_v0 }
   0xb   :  { %2142 = vmatprep.mubr.msk.bf16.mxu0 %vm2479_vm0, %v2478_v0  ;;  %2139 = vmatpush3.bf16.msra.mxu0 %v2576_v33 }
   0xc   :  { %2140 = vmatprep.subr.bf16.mxu0 %v2478_v0 }
   0xf   :  { %2141 = vmatpush3.bf16.msra.mxu0 %v2588_v35 }
  0x10   :  { %2154 = vmatprep.subr.bf16.mxu0 %v2478_v0 }
  0x75   :  { %v111_v24 = vpop.permute.xlu1 %110 }
  0x79   :  { %v113_v26 = vpop.permute.xlu1 %112 }
  0xca   :  { %v93_v7 = vpop.f32.mrf.mxu0 }
  0xcb   :  { %v100_v8 = vadd.f32 %v93_v7, %v40_v6 }
  0xcc   :  { %v2128_v9 = vpop.f32.mrf.mxu0 }
  0xcd   :  { %2335 = vtanh.f32 %v100_v8 }
  0xce   :  { %v96_v11 = vpop.f32.mrf.mxu0 }
  0xcf   :  { %v101_v12 = vadd.f32 %v96_v11, %v41_v10 }
  0xd0   :  { %v2129_v13 = vpop.f32.mrf.mxu0 }
  0xd1   :  { %2337 = vtanh.f32 %v101_v12 }
  0xda   :  { %v2336_v14 = vpop.eup %2335 }
  0xdb   :  { %120 = vrot.lane.b32.xlu0 %v2336_v14, %s2481_s30  ;;  %v104_v16 = vmul.f32 0.5, %v2336_v14 }
  0xdd   :  { %v106_v17 = vadd.f32 0.5, %v104_v16 }
  0xde   :  { %v2338_v15 = vpop.eup %2337 }
  0xdf   :  { %122 = vrot.lane.b32.xlu0 %v2338_v15, %s2481_s30  ;;  %v105_v18 = vmul.f32 0.5, %v2338_v15  ;;  %v116_v25 = vmul.f32 %v111_v24, %v106_v17 }
  0xe1   :  { %v107_v21 = vadd.f32 0.5, %v105_v18 }
  0xe3   :  { %v117_v29 = vmul.f32 %v113_v26, %v107_v21 }
 0x14d   :  { %v121_v19 = vpop.permute.xlu0 %120 }
 0x14e   :  { %v126_v20 = vmul.f32 %v121_v19, %v106_v17 }
 0x150   :  { %130 = vrot.lane.b32.xlu0 %v126_v20, %s2482_s6 }
 0x151   :  { %v123_v22 = vpop.permute.xlu0 %122 }
 0x152   :  { %v127_v23 = vmul.f32 %v123_v22, %v107_v21 }
 0x154   :  { %132 = vrot.lane.b32.xlu1 %v127_v23, %s2482_s6 }
 0x1c2   :  { %v131_v27 = vpop.permute.xlu0 %130 }
 0x1c3   :  { %v2562_v28 = vadd.f32 %v131_v27, %v116_v25 }
 0x1c5   :  { %2339 = vtanh.f32 %v2562_v28 }
 0x1c6   :  { %v133_v30 = vpop.permute.xlu1 %132 }
 0x1c7   :  { %v2565_v31 = vadd.f32 %v133_v30, %v117_v29 }
 0x1c9   :  { %2341 = vtanh.f32 %v2565_v31 }
 0x1d2   :  { %v2340_v36 = vpop.eup %2339 }
 0x1d3   :  { %142 = vrot.lane.b32.xlu0 %v2340_v36, %s2481_s30 }
 0x1d6   :  { %v2342_v37 = vpop.eup %2341 }
 0x1d7   :  { %144 = vrot.lane.b32.xlu1 %v2342_v37, %s2481_s30  ;;  %152 = vrot.lane.b32.xlu0 %v42_v5, %s2480_s26 }
 0x245   :  { %v143_v38 = vpop.permute.xlu0 %142 }
 0x246   :  { %v148_v41 = vmul.f32 %v143_v38, %v106_v17 }
 0x249   :  { %v145_v39 = vpop.permute.xlu1 %144  ;;  %v153_v40 = vpop.permute.xlu0 %152 }
 0x24a   :  { %v149_v42 = vmul.f32 %v145_v39, %v107_v21  ;;  %2135 = vmatmul.mubr.msk.bf16.vlgmr.msra.gmra.mxu1 %vm55_vm1, %v153_v40 }
 0x24b   :  { %2147 = vmatpush3.bf16.msra.mxu1 %v2517_v1  ;;  %2150 = vmatprep.mubr.msk.bf16.mxu1 %vm2479_vm0, %v2478_v0 }
 0x24c   :  { %v150_v43 = vpack.c.bf16 %v149_v42, %v148_v41  ;;  %2148 = vmatprep.subr.bf16.mxu1 %v2478_v0 }
 0x24e   :  { %211 = vrot.lane.b32.xlu1 %v150_v43, %s2482_s6 }
 0x24f   :  { %2149 = vmatpush3.bf16.msra.mxu1 %v2528_v2 }
 0x250   :  { %2162 = vmatprep.subr.bf16.mxu1 %v2478_v0 }
 0x2c0   :  { %v212_v44 = vpop.permute.xlu1 %211 }
 0x2c1   :  { %2143 = vmatmul.mubr.msk.bf16.vlgmr.msra.gmra.mxu0 %vm55_vm1, %v212_v44  ;;  %2151 = vmatmul.mubr.msk.bf16.vlgmr.msra.gmra.mxu1 %vm55_vm1, %v212_v44 }
 0x2c2   :  { %2155 = vmatpush3.bf16.msra.mxu0 %v2571_v32  ;;  %2163 = vmatpush3.bf16.msra.mxu1 %v2576_v33 }
 0x2c3   :  { %2156 = vmatprep.subr.bf16.mxu0 %v2478_v0  ;;  %2158 = vmatprep.mubr.msk.bf16.mxu0 %vm2479_vm0, %v2478_v0 }
 0x2c4   :  { %2164 = vmatprep.subr.bf16.mxu1 %v2478_v0  ;;  %2166 = vmatprep.mubr.msk.bf16.mxu1 %vm2479_vm0, %v2478_v0 }
 0x2c6   :  { %2157 = vmatpush3.bf16.msra.mxu0 %v2582_v34  ;;  %2165 = vmatpush3.bf16.msra.mxu1 %v2588_v35 }
 0x2c7   :  { %2170 = vmatprep.subr.bf16.mxu0 %v2478_v0  ;;  %2178 = vmatprep.subr.bf16.mxu1 %v2478_v0 }
 0x30a   :  { %v203_v45 = vpop.f32.mrf.mxu1 }
 0x30c   :  { %v2136_v46 = vpop.f32.mrf.mxu1 }
 0x30e   :  { %v206_v47 = vpop.f32.mrf.mxu1 }
 0x310   :  { %v2137_v48 = vpop.f32.mrf.mxu1 }
 0x381   :  { %v262_v50 = vpop.f32.mrf.mxu0  ;;  %v357_v51 = vpop.f32.mrf.mxu1 }
 0x382   :  { %v263_v52 = vadd.f32 %v262_v50, %v203_v45  ;;  %v364_v57 = vadd.f32 %v357_v51, %v321_v53 }
 0x383   :  { %v2144_v54 = vpop.f32.mrf.mxu0  ;;  %v2152_v55 = vpop.f32.mrf.mxu1 }
 0x384   :  { %v273_v56 = vadd.f32 %v2624_v49, %v263_v52 }
 0x385   :  { %v265_v58 = vpop.f32.mrf.mxu0  ;;  %v360_v59 = vpop.f32.mrf.mxu1 }
 0x386   :  { %2343 = vtanh.f32 %v273_v56  ;;  %v266_v60 = vadd.f32 %v265_v58, %v206_v47  ;;  %v365_v6 = vadd.f32 %v360_v59, %v322_v61 }
 0x387   :  { %v2145_v62 = vpop.f32.mrf.mxu0  ;;  %v2153_v63 = vpop.f32.mrf.mxu1  ;;  %2345 = vtanh.f32 %v364_v57 }
 0x388   :  { %v274_v5 = vadd.f32 %v2624_v49, %v266_v60 }
 0x38a   :  { %2347 = vtanh.f32 %v274_v5 }
 0x38b   :  { %2349 = vtanh.f32 %v365_v6 }
 0x393   :  { %v2344_v7 = vpop.eup %2343 }
 0x394   :  { %291 = vrot.lane.b32.xlu0 %v2344_v7, %s2481_s30  ;;  %v2346_v8 = vpop.eup %2345  ;;  %v277_v11 = vmul.f32 0.5, %v2344_v7 }
 0x395   :  { %v368_v14 = vmul.f32 0.5, %v2346_v8 }
 0x396   :  { %v279_v12 = vadd.f32 0.5, %v277_v11 }
 0x397   :  { %v2348_v9 = vpop.eup %2347  ;;  %v370_v18 = vadd.f32 0.5, %v368_v14 }
 0x398   :  { %293 = vrot.lane.b32.xlu1 %v2348_v9, %s2481_s30  ;;  %376 = vrot.lane.b32.xlu0 %v2346_v8, %s2481_s30  ;;  %v2350_v10 = vpop.eup %2349  ;;  %v278_v13 = vmul.f32 0.5, %v2348_v9  ;;  %v544_v8 = vld [vmem:[%s3110_s0 + $0x20] sm:$0xff] }
 0x399   :  { %v369_v19 = vmul.f32 0.5, %v2350_v10  ;;  %v372_v37 = vmul.f32 %v370_v18, %v2562_v28 }
 0x39a   :  { %v280_v17 = vadd.f32 0.5, %v278_v13 }
 0x39c   :  { %281 = vrot.lane.b32.xlu0 %v2533_v3, %s2481_s30  ;;  %378 = vrot.lane.b32.xlu1 %v2350_v10, %s2481_s30 }
 0x3a0   :  { %283 = vrot.lane.b32.xlu1 %v2538_v4, %s2481_s30  ;;  %v371_v4 = vadd.f32 0.5, %v369_v19 }
 0x3a2   :  { %v373_v42 = vmul.f32 %v371_v4, %v2565_v31 }
 0x406   :  { %v292_v15 = vpop.permute.xlu0 %291 }
 0x407   :  { %v297_v16 = vmul.f32 %v292_v15, %v279_v12 }
 0x409   :  { %301 = vrot.lane.b32.xlu0 %v297_v16, %s2482_s6  ;;  %v545_v16 = vld [vmem:[%s3110_s0 + $0x28] sm:$0xff] }
 0x40a   :  { %v294_v20 = vpop.permute.xlu1 %293  ;;  %v377_v21 = vpop.permute.xlu0 %376 }
 0x40b   :  { %v298_v22 = vmul.f32 %v294_v20, %v280_v17  ;;  %v382_v3 = vmul.f32 %v377_v21, %v370_v18 }
 0x40d   :  { %386 = vrot.lane.b32.xlu0 %v382_v3, %s2482_s6  ;;  %303 = vrot.lane.b32.xlu1 %v298_v22, %s2482_s6 }
 0x40e   :  { %v379_v23 = vpop.permute.xlu1 %378  ;;  %v282_v25 = vpop.permute.xlu0 %281 }
 0x40f   :  { %v383_v24 = vmul.f32 %v379_v23, %v371_v4  ;;  %v287_v26 = vmul.f32 %v282_v25, %v279_v12 }
 0x411   :  { %388 = vrot.lane.b32.xlu1 %v383_v24, %s2482_s6 }
 0x412   :  { %v284_v27 = vpop.permute.xlu1 %283 }
 0x413   :  { %v288_v36 = vmul.f32 %v284_v27, %v280_v17 }
 0x47b   :  { %v302_v29 = vpop.permute.xlu0 %301 }
 0x47c   :  { %v2646_v30 = vadd.f32 %v302_v29, %v287_v26 }
 0x47e   :  { %2351 = vtanh.f32 %v2646_v30 }
 0x47f   :  { %v387_v38 = vpop.permute.xlu0 %386  ;;  %v304_v39 = vpop.permute.xlu1 %303 }
 0x480   :  { %v2650_v40 = vadd.f32 %v387_v38, %v372_v37  ;;  %v2652_v41 = vadd.f32 %v304_v39, %v288_v36 }
 0x482   :  { %2353 = vtanh.f32 %v2650_v40 }
 0x483   :  { %2355 = vtanh.f32 %v2652_v41  ;;  %v389_v43 = vpop.permute.xlu1 %388 }
 0x484   :  { %v2657_v44 = vadd.f32 %v389_v43, %v373_v42 }
 0x486   :  { %2357 = vtanh.f32 %v2657_v44 }
 0x48b   :  { %v2352_v45 = vpop.eup %2351 }
 0x48c   :  { %313 = vrot.lane.b32.xlu0 %v2352_v45, %s2481_s30 }
 0x48f   :  { %v2354_v28 = vpop.eup %2353 }
 0x490   :  { %v2356_v46 = vpop.eup %2355  ;;  %398 = vrot.lane.b32.xlu0 %v2354_v28, %s2481_s30 }
 0x491   :  { %315 = vrot.lane.b32.xlu1 %v2356_v46, %s2481_s30 }
 0x493   :  { %v2358_v47 = vpop.eup %2357 }
 0x495   :  { %400 = vrot.lane.b32.xlu1 %v2358_v47, %s2481_s30 }
 0x4fe   :  { %v314_v31 = vpop.permute.xlu0 %313 }
 0x4ff   :  { %v319_v50 = vmul.f32 %v314_v31, %v279_v12 }
 0x502   :  { %v399_v52 = vpop.permute.xlu0 %398 }
 0x503   :  { %v316_v48 = vpop.permute.xlu1 %315  ;;  %v404_v55 = vmul.f32 %v399_v52, %v370_v18 }
 0x504   :  { %v320_v51 = vmul.f32 %v316_v48, %v280_v17 }
 0x506   :  { %v407_v53 = vpack.c.bf16 %v320_v51, %v319_v50 }
 0x507   :  { %v401_v54 = vpop.permute.xlu1 %400 }
 0x508   :  { %v405_v56 = vmul.f32 %v401_v54, %v371_v4  ;;  %409 = vrot.lane.b32.xlu0 %v407_v53, %s2482_s6 }
 0x50a   :  { %v406_v57 = vpack.c.bf16 %v405_v56, %v404_v55 }
 0x50c   :  { %456 = vrot.lane.b32.xlu1 %v406_v57, %s2482_s6 }
 0x57a   :  { %v410_v58 = vpop.permute.xlu0 %409 }
 0x57b   :  { %2159 = vmatmul.mubr.msk.bf16.vlgmr.msra.gmra.mxu0 %vm55_vm1, %v410_v58 }
 0x57c   :  { %2171 = vmatpush3.bf16.msra.mxu0 %v2517_v1  ;;  %2174 = vmatprep.mubr.msk.bf16.mxu0 %vm2479_vm0, %v2478_v0 }
 0x57d   :  { %2172 = vmatprep.subr.bf16.mxu0 %v2478_v0 }
 0x57e   :  { %v457_v59 = vpop.permute.xlu1 %456 }
 0x57f   :  { %2167 = vmatmul.mubr.msk.bf16.vlgmr.msra.gmra.mxu1 %vm55_vm1, %v457_v59 }
 0x580   :  { %2173 = vmatpush3.bf16.msra.mxu0 %v2528_v2  ;;  %2179 = vmatpush3.bf16.msra.mxu1 %v2571_v32 }
 0x581   :  { %2186 = vmatprep.subr.bf16.mxu0 %v2478_v0  ;;  %2180 = vmatprep.subr.bf16.mxu1 %v2478_v0 }
 0x582   :  { %2182 = vmatprep.mubr.msk.bf16.mxu1 %vm2479_vm0, %v2478_v0 }
 0x583   :  { %2175 = vmatmul.mubr.msk.bf16.vlgmr.msra.gmra.mxu0 %vm55_vm1, %v457_v59 }
 0x584   :  { %2187 = vmatpush3.bf16.msra.mxu0 %v2576_v33  ;;  %2181 = vmatpush3.bf16.msra.mxu1 %v2582_v34 }
 0x585   :  { %2188 = vmatprep.subr.bf16.mxu0 %v2478_v0  ;;  %2194 = vmatprep.subr.bf16.mxu1 %v2478_v0 }
 0x586   :  { %2190 = vmatprep.mubr.msk.bf16.mxu0 %vm2479_vm0, %v2478_v0 }
 0x588   :  { %2189 = vmatpush3.bf16.msra.mxu0 %v2588_v35 }
 0x589   :  { %2202 = vmatprep.subr.bf16.mxu0 %v2478_v0 }
 0x63b   :  { %v448_v60 = vpop.f32.mrf.mxu0 }
 0x63d   :  { %v2160_v61 = vpop.f32.mrf.mxu0 }
 0x63f   :  { %v451_v62 = vpop.f32.mrf.mxu0  ;;  %v495_v63 = vpop.f32.mrf.mxu1 }
 0x640   :  { %v496_v5 = vadd.f32 %v495_v63, %v448_v60 }
 0x641   :  { %v2161_v6 = vpop.f32.mrf.mxu0  ;;  %v2168_v7 = vpop.f32.mrf.mxu1 }
 0x642   :  { %v502_v9 = vadd.f32 %v2624_v49, %v496_v5 }
 0x643   :  { %v498_v10 = vpop.f32.mrf.mxu1  ;;  %v580_v11 = vpop.f32.mrf.mxu0 }
 0x644   :  { %2359 = vtanh.f32 %v502_v9  ;;  %v499_v12 = vadd.f32 %v498_v10, %v451_v62  ;;  %v587_v13 = vadd.f32 %v580_v11, %v544_v8 }
 0x645   :  { %v2169_v14 = vpop.f32.mrf.mxu1  ;;  %v2176_v15 = vpop.f32.mrf.mxu0 }
 0x646   :  { %v503_v17 = vadd.f32 %v2624_v49, %v499_v12  ;;  %2361 = vtanh.f32 %v587_v13 }
 0x647   :  { %v583_v18 = vpop.f32.mrf.mxu0 }
 0x648   :  { %2363 = vtanh.f32 %v503_v17  ;;  %v588_v19 = vadd.f32 %v583_v18, %v545_v16 }
 0x649   :  { %v2177_v20 = vpop.f32.mrf.mxu0 }
 0x64a   :  { %2365 = vtanh.f32 %v588_v19  ;;  %v767_v20 = vld [vmem:[%s3110_s0 + $0x30] sm:$0xff] }
 0x651   :  { %v2360_v21 = vpop.eup %2359 }
 0x652   :  { %514 = vrot.lane.b32.xlu0 %v2360_v21, %s2481_s30  ;;  %v506_v23 = vmul.f32 0.5, %v2360_v21 }
 0x653   :  { %v2362_v22 = vpop.eup %2361 }
 0x654   :  { %v508_v24 = vadd.f32 0.5, %v506_v23  ;;  %v591_v25 = vmul.f32 0.5, %v2362_v22 }
 0x655   :  { %v2364_v3 = vpop.eup %2363 }
 0x656   :  { %599 = vrot.lane.b32.xlu0 %v2362_v22, %s2481_s30  ;;  %516 = vrot.lane.b32.xlu1 %v2364_v3, %s2481_s30  ;;  %v507_v26 = vmul.f32 0.5, %v2364_v3  ;;  %v593_v36 = vadd.f32 0.5, %v591_v25  ;;  %v510_v31 = vmul.f32 %v508_v24, %v2646_v30 }
 0x657   :  { %v2366_v4 = vpop.eup %2365 }
 0x658   :  { %v509_v37 = vadd.f32 0.5, %v507_v26  ;;  %v592_v38 = vmul.f32 0.5, %v2366_v4  ;;  %v595_v51 = vmul.f32 %v593_v36, %v2650_v40  ;;  %v768_v26 = vld [vmem:[%s3110_s0 + $0x38] sm:$0xff] }
 0x65a   :  { %601 = vrot.lane.b32.xlu1 %v2366_v4, %s2481_s30  ;;  %v594_v28 = vadd.f32 0.5, %v592_v38  ;;  %v511_v52 = vmul.f32 %v509_v37, %v2652_v41 }
 0x65c   :  { %v596_v57 = vmul.f32 %v594_v28, %v2657_v44 }
 0x6c4   :  { %v515_v27 = vpop.permute.xlu0 %514 }
 0x6c5   :  { %v520_v29 = vmul.f32 %v515_v27, %v508_v24 }
 0x6c7   :  { %524 = vrot.lane.b32.xlu0 %v520_v29, %s2482_s6 }
 0x6c8   :  { %v600_v39 = vpop.permute.xlu0 %599  ;;  %v517_v42 = vpop.permute.xlu1 %516 }
 0x6c9   :  { %v605_v43 = vmul.f32 %v600_v39, %v593_v36  ;;  %v521_v45 = vmul.f32 %v517_v42, %v509_v37 }
 0x6cb   :  { %609 = vrot.lane.b32.xlu0 %v605_v43, %s2482_s6  ;;  %526 = vrot.lane.b32.xlu1 %v521_v45, %s2482_s6 }
 0x6cc   :  { %v602_v46 = vpop.permute.xlu1 %601 }
 0x6cd   :  { %v606_v47 = vmul.f32 %v602_v46, %v594_v28 }
 0x6cf   :  { %611 = vrot.lane.b32.xlu1 %v606_v47, %s2482_s6 }
 0x739   :  { %v525_v48 = vpop.permute.xlu0 %524 }
 0x73a   :  { %v2704_v50 = vadd.f32 %v525_v48, %v510_v31 }
 0x73c   :  { %2367 = vtanh.f32 %v2704_v50 }
 0x73d   :  { %v610_v53 = vpop.permute.xlu0 %609  ;;  %v527_v54 = vpop.permute.xlu1 %526 }
 0x73e   :  { %v2709_v55 = vadd.f32 %v610_v53, %v595_v51  ;;  %v2711_v56 = vadd.f32 %v527_v54, %v511_v52 }
 0x740   :  { %2369 = vtanh.f32 %v2709_v55 }
 0x741   :  { %2371 = vtanh.f32 %v2711_v56  ;;  %v612_v30 = vpop.permute.xlu1 %611 }
 0x742   :  { %v2716_v58 = vadd.f32 %v612_v30, %v596_v57 }
 0x744   :  { %2373 = vtanh.f32 %v2716_v58 }
 0x749   :  { %v2368_v40 = vpop.eup %2367 }
 0x74a   :  { %536 = vrot.lane.b32.xlu0 %v2368_v40, %s2481_s30 }
 0x74d   :  { %v2370_v41 = vpop.eup %2369 }
 0x74e   :  { %v2372_v59 = vpop.eup %2371  ;;  %621 = vrot.lane.b32.xlu0 %v2370_v41, %s2481_s30 }
 0x74f   :  { %538 = vrot.lane.b32.xlu1 %v2372_v59, %s2481_s30 }
 0x751   :  { %v2374_v60 = vpop.eup %2373 }
 0x753   :  { %623 = vrot.lane.b32.xlu1 %v2374_v60, %s2481_s30 }
 0x7bc   :  { %v537_v44 = vpop.permute.xlu0 %536 }
 0x7bd   :  { %v542_v62 = vmul.f32 %v537_v44, %v508_v24 }
 0x7c0   :  { %v622_v5 = vpop.permute.xlu0 %621 }
 0x7c1   :  { %v539_v61 = vpop.permute.xlu1 %538  ;;  %v627_v8 = vmul.f32 %v622_v5, %v593_v36 }
 0x7c2   :  { %v543_v63 = vmul.f32 %v539_v61, %v509_v37 }
 0x7c4   :  { %v630_v6 = vpack.c.bf16 %v543_v63, %v542_v62 }
 0x7c5   :  { %v624_v7 = vpop.permute.xlu1 %623 }
 0x7c6   :  { %v628_v9 = vmul.f32 %v624_v7, %v594_v28  ;;  %632 = vrot.lane.b32.xlu0 %v630_v6, %s2482_s6 }
 0x7c8   :  { %v629_v10 = vpack.c.bf16 %v628_v9, %v627_v8 }
 0x7ca   :  { %679 = vrot.lane.b32.xlu1 %v629_v10, %s2482_s6 }
 0x838   :  { %v633_v11 = vpop.permute.xlu0 %632 }
 0x839   :  { %2183 = vmatmul.mubr.msk.bf16.vlgmr.msra.gmra.mxu1 %vm55_vm1, %v633_v11 }
 0x83a   :  { %2195 = vmatpush3.bf16.msra.mxu1 %v2517_v1  ;;  %2198 = vmatprep.mubr.msk.bf16.mxu1 %vm2479_vm0, %v2478_v0 }
 0x83b   :  { %2196 = vmatprep.subr.bf16.mxu1 %v2478_v0 }
 0x83c   :  { %v680_v12 = vpop.permute.xlu1 %679 }
 0x83d   :  { %2191 = vmatmul.mubr.msk.bf16.vlgmr.msra.gmra.mxu0 %vm55_vm1, %v680_v12 }
 0x83e   :  { %2197 = vmatpush3.bf16.msra.mxu1 %v2528_v2  ;;  %2203 = vmatpush3.bf16.msra.mxu0 %v2571_v32 }
 0x83f   :  { %2210 = vmatprep.subr.bf16.mxu1 %v2478_v0  ;;  %2204 = vmatprep.subr.bf16.mxu0 %v2478_v0 }
 0x840   :  { %2206 = vmatprep.mubr.msk.bf16.mxu0 %vm2479_vm0, %v2478_v0 }
 0x841   :  { %2199 = vmatmul.mubr.msk.bf16.vlgmr.msra.gmra.mxu1 %vm55_vm1, %v680_v12 }
 0x842   :  { %2211 = vmatpush3.bf16.msra.mxu1 %v2576_v33  ;;  %2205 = vmatpush3.bf16.msra.mxu0 %v2582_v34 }
 0x843   :  { %2212 = vmatprep.subr.bf16.mxu1 %v2478_v0  ;;  %2218 = vmatprep.subr.bf16.mxu0 %v2478_v0 }
 0x844   :  { %2214 = vmatprep.mubr.msk.bf16.mxu1 %vm2479_vm0, %v2478_v0 }
 0x846   :  { %2213 = vmatpush3.bf16.msra.mxu1 %v2588_v35 }
 0x847   :  { %2226 = vmatprep.subr.bf16.mxu1 %v2478_v0 }
 0x8f9   :  { %v671_v13 = vpop.f32.mrf.mxu1 }
 0x8fb   :  { %v2184_v14 = vpop.f32.mrf.mxu1 }
 0x8fd   :  { %v674_v15 = vpop.f32.mrf.mxu1  ;;  %v718_v16 = vpop.f32.mrf.mxu0 }
 0x8fe   :  { %v719_v17 = vadd.f32 %v718_v16, %v671_v13 }
 0x8ff   :  { %v2185_v18 = vpop.f32.mrf.mxu1  ;;  %v2192_v19 = vpop.f32.mrf.mxu0 }
 0x900   :  { %v725_v21 = vadd.f32 %v2624_v49, %v719_v17 }
 0x901   :  { %v721_v22 = vpop.f32.mrf.mxu0  ;;  %v803_v3 = vpop.f32.mrf.mxu1 }
 0x902   :  { %2375 = vtanh.f32 %v725_v21  ;;  %v722_v4 = vadd.f32 %v721_v22, %v674_v15  ;;  %v810_v23 = vadd.f32 %v803_v3, %v767_v20 }
 0x903   :  { %v2193_v24 = vpop.f32.mrf.mxu0  ;;  %v2200_v25 = vpop.f32.mrf.mxu1 }
 0x904   :  { %v726_v27 = vadd.f32 %v2624_v49, %v722_v4  ;;  %2377 = vtanh.f32 %v810_v23 }
 0x905   :  { %v806_v29 = vpop.f32.mrf.mxu1 }
 0x906   :  { %2379 = vtanh.f32 %v726_v27  ;;  %v811_v36 = vadd.f32 %v806_v29, %v768_v26  ;;  %v990_v29 = vld [vmem:[%s3110_s0 + $0x40] sm:$0xff] }
 0x907   :  { %v2201_v37 = vpop.f32.mrf.mxu1 }
 0x908   :  { %2381 = vtanh.f32 %v811_v36 }
 0x90f   :  { %v2376_v38 = vpop.eup %2375 }
 0x910   :  { %737 = vrot.lane.b32.xlu0 %v2376_v38, %s2481_s30  ;;  %v729_v45 = vmul.f32 0.5, %v2376_v38 }
 0x911   :  { %v2378_v39 = vpop.eup %2377 }
 0x912   :  { %v731_v28 = vadd.f32 0.5, %v729_v45  ;;  %v814_v47 = vmul.f32 0.5, %v2378_v39 }
 0x913   :  { %v2380_v42 = vpop.eup %2379 }
 0x914   :  { %739 = vrot.lane.b32.xlu1 %v2380_v42, %s2481_s30  ;;  %822 = vrot.lane.b32.xlu0 %v2378_v39, %s2481_s30  ;;  %v730_v46 = vmul.f32 0.5, %v2380_v42  ;;  %v816_v52 = vadd.f32 0.5, %v814_v47  ;;  %v733_v44 = vmul.f32 %v731_v28, %v2704_v50 }
 0x915   :  { %v2382_v43 = vpop.eup %2381 }
 0x916   :  { %v732_v51 = vadd.f32 0.5, %v730_v46  ;;  %v815_v53 = vmul.f32 0.5, %v2382_v43  ;;  %v818_v63 = vmul.f32 %v816_v52, %v2709_v55 }
 0x918   :  { %824 = vrot.lane.b32.xlu1 %v2382_v43, %s2481_s30  ;;  %v817_v41 = vadd.f32 0.5, %v815_v53  ;;  %v734_v5 = vmul.f32 %v732_v51, %v2711_v56 }
 0x91a   :  { %v819_v10 = vmul.f32 %v817_v41, %v2716_v58 }
 0x982   :  { %v738_v31 = vpop.permute.xlu0 %737 }
 0x983   :  { %v743_v48 = vmul.f32 %v738_v31, %v731_v28 }
 0x985   :  { %747 = vrot.lane.b32.xlu0 %v743_v48, %s2482_s6 }
 0x986   :  { %v740_v54 = vpop.permute.xlu1 %739  ;;  %v823_v57 = vpop.permute.xlu0 %822 }
 0x987   :  { %v744_v30 = vmul.f32 %v740_v54, %v732_v51  ;;  %v828_v40 = vmul.f32 %v823_v57, %v816_v52 }
 0x989   :  { %832 = vrot.lane.b32.xlu0 %v828_v40, %s2482_s6  ;;  %749 = vrot.lane.b32.xlu1 %v744_v30, %s2482_s6 }
 0x98a   :  { %v825_v59 = vpop.permute.xlu1 %824 }
 0x98b   :  { %v829_v60 = vmul.f32 %v825_v59, %v817_v41 }
 0x98d   :  { %834 = vrot.lane.b32.xlu1 %v829_v60, %s2482_s6 }
 0x9f7   :  { %v748_v61 = vpop.permute.xlu0 %747 }
 0x9f8   :  { %v2763_v62 = vadd.f32 %v748_v61, %v733_v44 }
 0x9fa   :  { %2383 = vtanh.f32 %v2763_v62 }
 0x9fb   :  { %v833_v6 = vpop.permute.xlu0 %832  ;;  %v750_v7 = vpop.permute.xlu1 %749 }
 0x9fc   :  { %v2768_v8 = vadd.f32 %v833_v6, %v818_v63  ;;  %v2770_v9 = vadd.f32 %v750_v7, %v734_v5 }
 0x9fe   :  { %2385 = vtanh.f32 %v2768_v8 }
 0x9ff   :  { %2387 = vtanh.f32 %v2770_v9  ;;  %v835_v50 = vpop.permute.xlu1 %834 }
 0xa00   :  { %v2775_v11 = vadd.f32 %v835_v50, %v819_v10 }
 0xa02   :  { %2389 = vtanh.f32 %v2775_v11 }
 0xa07   :  { %v2384_v55 = vpop.eup %2383 }
 0xa08   :  { %759 = vrot.lane.b32.xlu0 %v2384_v55, %s2481_s30 }
 0xa0b   :  { %v2386_v56 = vpop.eup %2385 }
 0xa0c   :  { %v2388_v12 = vpop.eup %2387  ;;  %844 = vrot.lane.b32.xlu0 %v2386_v56, %s2481_s30 }
 0xa0d   :  { %761 = vrot.lane.b32.xlu1 %v2388_v12, %s2481_s30 }
 0xa0f   :  { %v2390_v13 = vpop.eup %2389 }
 0xa11   :  { %846 = vrot.lane.b32.xlu1 %v2390_v13, %s2481_s30 }
 0xa7a   :  { %v760_v58 = vpop.permute.xlu0 %759 }
 0xa7b   :  { %v765_v15 = vmul.f32 %v760_v58, %v731_v28  ;;  %v991_v28 = vld [vmem:[%s3110_s0 + $0x48] sm:$0xff] }
 0xa7e   :  { %v845_v17 = vpop.permute.xlu0 %844 }
 0xa7f   :  { %v762_v14 = vpop.permute.xlu1 %761  ;;  %v850_v20 = vmul.f32 %v845_v17, %v816_v52 }
 0xa80   :  { %v766_v16 = vmul.f32 %v762_v14, %v732_v51 }
 0xa82   :  { %v853_v18 = vpack.c.bf16 %v766_v16, %v765_v15 }
 0xa83   :  { %v847_v19 = vpop.permute.xlu1 %846 }
 0xa84   :  { %v851_v21 = vmul.f32 %v847_v19, %v817_v41  ;;  %855 = vrot.lane.b32.xlu0 %v853_v18, %s2482_s6 }
 0xa86   :  { %v852_v22 = vpack.c.bf16 %v851_v21, %v850_v20 }
 0xa88   :  { %902 = vrot.lane.b32.xlu1 %v852_v22, %s2482_s6 }
 0xaf6   :  { %v856_v3 = vpop.permute.xlu0 %855 }
 0xaf7   :  { %2207 = vmatmul.mubr.msk.bf16.vlgmr.msra.gmra.mxu0 %vm55_vm1, %v856_v3 }
 0xaf8   :  { %2219 = vmatpush3.bf16.msra.mxu0 %v2517_v1  ;;  %2222 = vmatprep.mubr.msk.bf16.mxu0 %vm2479_vm0, %v2478_v0 }
 0xaf9   :  { %2220 = vmatprep.subr.bf16.mxu0 %v2478_v0 }
 0xafa   :  { %v903_v4 = vpop.permute.xlu1 %902 }
 0xafb   :  { %2215 = vmatmul.mubr.msk.bf16.vlgmr.msra.gmra.mxu1 %vm55_vm1, %v903_v4 }
 0xafc   :  { %2221 = vmatpush3.bf16.msra.mxu0 %v2528_v2  ;;  %2227 = vmatpush3.bf16.msra.mxu1 %v2571_v32 }
 0xafd   :  { %2234 = vmatprep.subr.bf16.mxu0 %v2478_v0  ;;  %2228 = vmatprep.subr.bf16.mxu1 %v2478_v0 }
 0xafe   :  { %2230 = vmatprep.mubr.msk.bf16.mxu1 %vm2479_vm0, %v2478_v0 }
 0xaff   :  { %2223 = vmatmul.mubr.msk.bf16.vlgmr.msra.gmra.mxu0 %vm55_vm1, %v903_v4 }
 0xb00   :  { %2235 = vmatpush3.bf16.msra.mxu0 %v2576_v33  ;;  %2229 = vmatpush3.bf16.msra.mxu1 %v2582_v34 }
 0xb01   :  { %2236 = vmatprep.subr.bf16.mxu0 %v2478_v0  ;;  %2242 = vmatprep.subr.bf16.mxu1 %v2478_v0 }
 0xb02   :  { %2238 = vmatprep.mubr.msk.bf16.mxu0 %vm2479_vm0, %v2478_v0 }
 0xb04   :  { %2237 = vmatpush3.bf16.msra.mxu0 %v2588_v35 }
 0xb05   :  { %2250 = vmatprep.subr.bf16.mxu0 %v2478_v0 }
 0xbb7   :  { %v894_v1 = vpop.f32.mrf.mxu0 }
 0xbb9   :  { %v2208_v2 = vpop.f32.mrf.mxu0 }
 0xbbb   :  { %v897_v23 = vpop.f32.mrf.mxu0  ;;  %v941_v24 = vpop.f32.mrf.mxu1 }
 0xbbc   :  { %v942_v25 = vadd.f32 %v941_v24, %v894_v1 }
 0xbbd   :  { %v2209_v26 = vpop.f32.mrf.mxu0  ;;  %v2216_v27 = vpop.f32.mrf.mxu1 }
 0xbbe   :  { %v948_v36 = vadd.f32 %v2624_v49, %v942_v25 }
 0xbbf   :  { %v944_v37 = vpop.f32.mrf.mxu1  ;;  %v1026_v38 = vpop.f32.mrf.mxu0 }
 0xbc0   :  { %2391 = vtanh.f32 %v948_v36  ;;  %v945_v39 = vadd.f32 %v944_v37, %v897_v23  ;;  %v1033_v42 = vadd.f32 %v1026_v38, %v990_v29  ;;  %v2847_v37 = vld [vmem:[%s3108_s2 + $0x8] sm:$0xff]  }
 0xbc1   :  { %v2217_v43 = vpop.f32.mrf.mxu1  ;;  %v2224_v45 = vpop.f32.mrf.mxu0 }
 0xbc2   :  { %v949_v46 = vadd.f32 %v2624_v49, %v945_v39  ;;  %2393 = vtanh.f32 %v1033_v42  ;;  %v2857_v39 = vld [vmem:[%s3108_s2] sm:$0xff]  }
 0xbc3   :  { %v1029_v47 = vpop.f32.mrf.mxu0 }
 0xbc4   :  { %2395 = vtanh.f32 %v949_v46  ;;  %v1034_v31 = vadd.f32 %v1029_v47, %v991_v28 }
 0xbc5   :  { %v2225_v48 = vpop.f32.mrf.mxu0 }
 0xbc6   :  { %2397 = vtanh.f32 %v1034_v31 }
 0xbcd   :  { %v2392_v51 = vpop.eup %2391 }
 0xbce   :  { %960 = vrot.lane.b32.xlu0 %v2392_v51, %s2481_s30  ;;  %v952_v57 = vmul.f32 0.5, %v2392_v51 }
 0xbcf   :  { %v2394_v52 = vpop.eup %2393 }
 0xbd0   :  { %v954_v30 = vadd.f32 0.5, %v952_v57  ;;  %v1037_v40 = vmul.f32 0.5, %v2394_v52 }
 0xbd1   :  { %v2396_v53 = vpop.eup %2395 }
 0xbd2   :  { %1045 = vrot.lane.b32.xlu0 %v2394_v52, %s2481_s30  ;;  %962 = vrot.lane.b32.xlu1 %v2396_v53, %s2481_s30  ;;  %v953_v41 = vmul.f32 0.5, %v2396_v53  ;;  %v1039_v44 = vadd.f32 0.5, %v1037_v40  ;;  %v956_v12 = vmul.f32 %v954_v30, %v2763_v62 }
 0xbd3   :  { %v2398_v54 = vpop.eup %2397 }
 0xbd4   :  { %v955_v61 = vadd.f32 0.5, %v953_v41  ;;  %v1038_v63 = vmul.f32 0.5, %v2398_v54  ;;  %v1041_v14 = vmul.f32 %v1039_v44, %v2768_v8 }
 0xbd6   :  { %1047 = vrot.lane.b32.xlu1 %v2398_v54, %s2481_s30  ;;  %v1040_v50 = vadd.f32 0.5, %v1038_v63  ;;  %v957_v15 = vmul.f32 %v955_v61, %v2770_v9  ;;  %v1214_v54 = vld [vmem:[%s3110_s0 + $0x58] sm:$0xff] }
 0xbd8   :  { %v1042_v20 = vmul.f32 %v1040_v50, %v2775_v11 }
 0xc40   :  { %v961_v59 = vpop.permute.xlu0 %960 }
 0xc41   :  { %v966_v60 = vmul.f32 %v961_v59, %v954_v30 }
 0xc43   :  { %970 = vrot.lane.b32.xlu0 %v966_v60, %s2482_s6 }
 0xc44   :  { %v1046_v5 = vpop.permute.xlu0 %1045  ;;  %v963_v6 = vpop.permute.xlu1 %962 }
 0xc45   :  { %v1051_v7 = vmul.f32 %v1046_v5, %v1039_v44  ;;  %v967_v10 = vmul.f32 %v963_v6, %v955_v61 }
 0xc47   :  { %1055 = vrot.lane.b32.xlu0 %v1051_v7, %s2482_s6  ;;  %972 = vrot.lane.b32.xlu1 %v967_v10, %s2482_s6 }
 0xc48   :  { %v1048_v55 = vpop.permute.xlu1 %1047 }
 0xc49   :  { %v1052_v56 = vmul.f32 %v1048_v55, %v1040_v50 }
 0xc4b   :  { %1057 = vrot.lane.b32.xlu1 %v1052_v56, %s2482_s6 }
 0xcb5   :  { %v971_v13 = vpop.permute.xlu0 %970 }
 0xcb6   :  { %v2822_v58 = vadd.f32 %v971_v13, %v956_v12 }
 0xcb8   :  { %2399 = vtanh.f32 %v2822_v58 }
 0xcb9   :  { %v1056_v16 = vpop.permute.xlu0 %1055  ;;  %v973_v17 = vpop.permute.xlu1 %972 }
 0xcba   :  { %v2827_v18 = vadd.f32 %v1056_v16, %v1041_v14  ;;  %v2829_v19 = vadd.f32 %v973_v17, %v957_v15 }
 0xcbc   :  { %2401 = vtanh.f32 %v2827_v18 }
 0xcbd   :  { %2403 = vtanh.f32 %v2829_v19  ;;  %v1058_v62 = vpop.permute.xlu1 %1057 }
 0xcbe   :  { %v2834_v21 = vadd.f32 %v1058_v62, %v1042_v20 }
 0xcc0   :  { %2405 = vtanh.f32 %v2834_v21 }
 0xcc5   :  { %v2400_v8 = vpop.eup %2399 }
 0xcc6   :  { %982 = vrot.lane.b32.xlu0 %v2400_v8, %s2481_s30 }
 0xcc9   :  { %v2402_v9 = vpop.eup %2401 }
 0xcca   :  { %v2404_v22 = vpop.eup %2403  ;;  %1067 = vrot.lane.b32.xlu0 %v2402_v9, %s2481_s30 }
 0xccb   :  { %984 = vrot.lane.b32.xlu1 %v2404_v22, %s2481_s30 }
 0xccd   :  { %v2406_v3 = vpop.eup %2405 }
 0xccf   :  { %1069 = vrot.lane.b32.xlu1 %v2406_v3, %s2481_s30 }
 0xd38   :  { %v983_v11 = vpop.permute.xlu0 %982 }
 0xd39   :  { %v988_v1 = vmul.f32 %v983_v11, %v954_v30 }
 0xd3c   :  { %v1068_v23 = vpop.permute.xlu0 %1067 }
 0xd3d   :  { %v985_v4 = vpop.permute.xlu1 %984  ;;  %v1073_v26 = vmul.f32 %v1068_v23, %v1039_v44 }
 0xd3e   :  { %v989_v2 = vmul.f32 %v985_v4, %v955_v61 }
 0xd40   :  { %v1076_v24 = vpack.c.bf16 %v989_v2, %v988_v1 }
 0xd41   :  { %v1070_v25 = vpop.permute.xlu1 %1069 }
 0xd42   :  { %v1074_v27 = vmul.f32 %v1070_v25, %v1040_v50  ;;  %1078 = vrot.lane.b32.xlu0 %v1076_v24, %s2482_s6 }
 0xd44   :  { %v1075_v29 = vpack.c.bf16 %v1074_v27, %v1073_v26 }
 0xd46   :  { %1125 = vrot.lane.b32.xlu1 %v1075_v29, %s2482_s6 }
 0xdb4   :  { %v1079_v36 = vpop.permute.xlu0 %1078 }
 0xdb5   :  { %2231 = vmatmul.mubr.msk.bf16.vlgmr.msra.gmra.mxu1 %vm55_vm1, %v1079_v36 }
 0xdb6   :  { %2243 = vmatpush3.bf16.msra.mxu1 %v2847_v37  ;;  %2246 = vmatprep.mubr.msk.bf16.mxu1 %vm2479_vm0, %v2478_v0 }
 0xdb7   :  { %2244 = vmatprep.subr.bf16.mxu1 %v2478_v0 }
 0xdb8   :  { %v1126_v38 = vpop.permute.xlu1 %1125 }
 0xdb9   :  { %2239 = vmatmul.mubr.msk.bf16.vlgmr.msra.gmra.mxu0 %vm55_vm1, %v1126_v38 }
 0xdba   :  { %2245 = vmatpush3.bf16.msra.mxu1 %v2857_v39  ;;  %2251 = vmatpush3.bf16.msra.mxu0 %v2571_v32 }
 0xdbb   :  { %2258 = vmatprep.subr.bf16.mxu1 %v2478_v0  ;;  %2252 = vmatprep.subr.bf16.mxu0 %v2478_v0 }
 0xdbc   :  { %2254 = vmatprep.mubr.msk.bf16.mxu0 %vm2479_vm0, %v2478_v0 }
 0xdbd   :  { %2247 = vmatmul.mubr.msk.bf16.vlgmr.msra.gmra.mxu1 %vm55_vm1, %v1126_v38 }
 0xdbe   :  { %2259 = vmatpush3.bf16.msra.mxu1 %v2576_v33  ;;  %2253 = vmatpush3.bf16.msra.mxu0 %v2582_v34  ;;  %v1213_v34 = vld [vmem:[%s3110_s0 + $0x50] sm:$0xff] }
 0xdbf   :  { %2260 = vmatprep.subr.bf16.mxu1 %v2478_v0  ;;  %2266 = vmatprep.subr.bf16.mxu0 %v2478_v0 }
 0xdc0   :  { %2262 = vmatprep.mubr.msk.bf16.mxu1 %vm2479_vm0, %v2478_v0 }
 0xdc2   :  { %2261 = vmatpush3.bf16.msra.mxu1 %v2588_v35 }
 0xdc3   :  { %2274 = vmatprep.subr.bf16.mxu1 %v2478_v0 }
 0xe75   :  { %v1117_v32 = vpop.f32.mrf.mxu1 }
 0xe77   :  { %v2232_v42 = vpop.f32.mrf.mxu1 }
 0xe79   :  { %v1120_v43 = vpop.f32.mrf.mxu1  ;;  %v1164_v45 = vpop.f32.mrf.mxu0 }
 0xe7a   :  { %v1165_v28 = vadd.f32 %v1164_v45, %v1117_v32 }
 0xe7b   :  { %v2233_v46 = vpop.f32.mrf.mxu1  ;;  %v2240_v33 = vpop.f32.mrf.mxu0 }
 0xe7c   :  { %v1171_v47 = vadd.f32 %v2624_v49, %v1165_v28 }
 0xe7d   :  { %v1167_v31 = vpop.f32.mrf.mxu0  ;;  %v1249_v48 = vpop.f32.mrf.mxu1 }
 0xe7e   :  { %2407 = vtanh.f32 %v1171_v47  ;;  %v1168_v51 = vadd.f32 %v1167_v31, %v1120_v43  ;;  %v1256_v35 = vadd.f32 %v1249_v48, %v1213_v34  ;;  %v2922_v34 = vld [vmem:[%s3108_s2 + $0x28] sm:$0xff]   ;;  %v2933_v47 = vld [vmem:[%s3108_s2 + $0x18] sm:$0xff]   ;;  %v2939_v31 = vld [vmem:[%s3108_s2 + $0x20] sm:$0xff]  }
 0xe7f   :  { %v2241_v52 = vpop.f32.mrf.mxu0  ;;  %v2248_v53 = vpop.f32.mrf.mxu1  ;;  %v2949_v48 = vld [vmem:[%s3108_s2 + $0x10] sm:$0xff]  }
 0xe80   :  { %v1172_v57 = vadd.f32 %v2624_v49, %v1168_v51  ;;  %2409 = vtanh.f32 %v1256_v35 }
 0xe81   :  { %v1252_v30 = vpop.f32.mrf.mxu1 }
 0xe82   :  { %2411 = vtanh.f32 %v1172_v57  ;;  %v1257_v40 = vadd.f32 %v1252_v30, %v1214_v54 }
 0xe83   :  { %v2249_v41 = vpop.f32.mrf.mxu1 }
 0xe84   :  { %2413 = vtanh.f32 %v1257_v40  ;;  %v1436_v40 = vld [vmem:[%s3110_s0 + $0x60] sm:$0xff] }
 0xe85   :  { %v2959_v41 = vld [vmem:[%s3111_s3] ss:$0 sm:$0xff] }
 0xe8b   :  { %v2408_v59 = vpop.eup %2407 }
 0xe8c   :  { %1183 = vrot.lane.b32.xlu0 %v2408_v59, %s2481_s30  ;;  %v1175_v63 = vmul.f32 0.5, %v2408_v59 }
 0xe8d   :  { %v2410_v60 = vpop.eup %2409 }
 0xe8e   :  { %v1177_v49 = vadd.f32 0.5, %v1175_v63  ;;  %v1260_v6 = vmul.f32 0.5, %v2410_v60 }
 0xe8f   :  { %v2412_v44 = vpop.eup %2411 }
 0xe90   :  { %1185 = vrot.lane.b32.xlu1 %v2412_v44, %s2481_s30  ;;  %1268 = vrot.lane.b32.xlu0 %v2410_v60, %s2481_s30  ;;  %v1176_v5 = vmul.f32 0.5, %v2412_v44  ;;  %v1262_v55 = vadd.f32 0.5, %v1260_v6  ;;  %v1179_v62 = vmul.f32 %v1177_v49, %v2822_v58  ;;  %v1437_v6 = vld [vmem:[%s3110_s0 + $0x68] sm:$0xff] }
 0xe91   :  { %v2414_v61 = vpop.eup %2413 }
 0xe92   :  { %v1178_v50 = vadd.f32 0.5, %v1176_v5  ;;  %v1261_v56 = vmul.f32 0.5, %v2414_v61  ;;  %v1264_v22 = vmul.f32 %v1262_v55, %v2827_v18 }
 0xe94   :  { %1270 = vrot.lane.b32.xlu1 %v2414_v61, %s2481_s30  ;;  %v1263_v16 = vadd.f32 0.5, %v1261_v56  ;;  %v1180_v3 = vmul.f32 %v1178_v50, %v2829_v19 }
 0xe96   :  { %v1265_v23 = vmul.f32 %v1263_v16, %v2834_v21 }
 0xefe   :  { %v1184_v7 = vpop.permute.xlu0 %1183 }
 0xeff   :  { %v1189_v10 = vmul.f32 %v1184_v7, %v1177_v49 }
 0xf01   :  { %1193 = vrot.lane.b32.xlu0 %v1189_v10, %s2482_s6 }
 0xf02   :  { %v1186_v12 = vpop.permute.xlu1 %1185  ;;  %v1269_v13 = vpop.permute.xlu0 %1268 }
 0xf03   :  { %v1190_v14 = vmul.f32 %v1186_v12, %v1178_v50  ;;  %v1274_v15 = vmul.f32 %v1269_v13, %v1262_v55 }
 0xf05   :  { %1278 = vrot.lane.b32.xlu0 %v1274_v15, %s2482_s6  ;;  %1195 = vrot.lane.b32.xlu1 %v1190_v14, %s2482_s6 }
 0xf06   :  { %v1271_v17 = vpop.permute.xlu1 %1270 }
 0xf07   :  { %v1275_v20 = vmul.f32 %v1271_v17, %v1263_v16 }
 0xf09   :  { %1280 = vrot.lane.b32.xlu1 %v1275_v20, %s2482_s6 }
 0xf73   :  { %v1194_v8 = vpop.permute.xlu0 %1193 }
 0xf74   :  { %v2891_v9 = vadd.f32 %v1194_v8, %v1179_v62 }
 0xf76   :  { %2415 = vtanh.f32 %v2891_v9 }
 0xf77   :  { %v1279_v11 = vpop.permute.xlu0 %1278  ;;  %v1196_v4 = vpop.permute.xlu1 %1195 }
 0xf78   :  { %v2896_v1 = vadd.f32 %v1279_v11, %v1264_v22  ;;  %v2898_v2 = vadd.f32 %v1196_v4, %v1180_v3 }
 0xf7a   :  { %2417 = vtanh.f32 %v2896_v1 }
 0xf7b   :  { %2419 = vtanh.f32 %v2898_v2  ;;  %v1281_v58 = vpop.permute.xlu1 %1280 }
 0xf7c   :  { %v2903_v24 = vadd.f32 %v1281_v58, %v1265_v23 }
 0xf7e   :  { %2421 = vtanh.f32 %v2903_v24 }
 0xf83   :  { %v2416_v18 = vpop.eup %2415 }
 0xf84   :  { %1205 = vrot.lane.b32.xlu0 %v2416_v18, %s2481_s30 }
 0xf87   :  { %v2418_v19 = vpop.eup %2417 }
 0xf88   :  { %v2420_v25 = vpop.eup %2419  ;;  %1290 = vrot.lane.b32.xlu0 %v2418_v19, %s2481_s30 }
 0xf89   :  { %1207 = vrot.lane.b32.xlu1 %v2420_v25, %s2481_s30 }
 0xf8b   :  { %v2422_v26 = vpop.eup %2421 }
 0xf8d   :  { %1292 = vrot.lane.b32.xlu1 %v2422_v26, %s2481_s30 }
 0xff6   :  { %v1206_v21 = vpop.permute.xlu0 %1205 }
 0xff7   :  { %v1211_v29 = vmul.f32 %v1206_v21, %v1177_v49 }
 0xffa   :  { %v1291_v38 = vpop.permute.xlu0 %1290 }
 0xffb   :  { %v1208_v27 = vpop.permute.xlu1 %1207  ;;  %v1296_v43 = vmul.f32 %v1291_v38, %v1262_v55 }
 0xffc   :  { %v1212_v36 = vmul.f32 %v1208_v27, %v1178_v50 }
 0xffe   :  { %v1299_v32 = vpack.c.bf16 %v1212_v36, %v1211_v29 }
 0xfff   :  { %v1293_v42 = vpop.permute.xlu1 %1292 }
0x1000   :  { %v1297_v45 = vmul.f32 %v1293_v42, %v1263_v16  ;;  %1301 = vrot.lane.b32.xlu0 %v1299_v32, %s2482_s6 }
0x1002   :  { %v1298_v28 = vpack.c.bf16 %v1297_v45, %v1296_v43 }
0x1004   :  { %1348 = vrot.lane.b32.xlu1 %v1298_v28, %s2482_s6 }
0x1072   :  { %v1302_v46 = vpop.permute.xlu0 %1301 }
0x1073   :  { %2255 = vmatmul.mubr.msk.bf16.vlgmr.msra.gmra.mxu0 %vm55_vm1, %v1302_v46 }
0x1074   :  { %2267 = vmatpush3.bf16.msra.mxu0 %v2847_v37  ;;  %2270 = vmatprep.mubr.msk.bf16.mxu0 %vm2479_vm0, %v2478_v0 }
0x1075   :  { %2268 = vmatprep.subr.bf16.mxu0 %v2478_v0 }
0x1076   :  { %v1349_v33 = vpop.permute.xlu1 %1348 }
0x1077   :  { %2263 = vmatmul.mubr.msk.bf16.vlgmr.msra.gmra.mxu1 %vm55_vm1, %v1349_v33 }
0x1078   :  { %2269 = vmatpush3.bf16.msra.mxu0 %v2857_v39  ;;  %2275 = vmatpush3.bf16.msra.mxu1 %v2922_v34 }
0x1079   :  { %2282 = vmatprep.subr.bf16.mxu0 %v2478_v0  ;;  %2276 = vmatprep.subr.bf16.mxu1 %v2478_v0 }
0x107a   :  { %2278 = vmatprep.mubr.msk.bf16.mxu1 %vm2479_vm0, %v2478_v0 }
0x107b   :  { %2271 = vmatmul.mubr.msk.bf16.vlgmr.msra.gmra.mxu0 %vm55_vm1, %v1349_v33 }
0x107c   :  { %2283 = vmatpush3.bf16.msra.mxu0 %v2933_v47  ;;  %2277 = vmatpush3.bf16.msra.mxu1 %v2939_v31 }
0x107d   :  { %2284 = vmatprep.subr.bf16.mxu0 %v2478_v0  ;;  %2290 = vmatprep.subr.bf16.mxu1 %v2478_v0 }
0x107e   :  { %2286 = vmatprep.mubr.msk.bf16.mxu0 %vm2479_vm0, %v2478_v0 }
0x1080   :  { %2285 = vmatpush3.bf16.msra.mxu0 %v2949_v48 }
0x1081   :  { %2298 = vmatprep.subr.bf16.mxu0 %v2478_v0 }
0x1133   :  { %v1340_v51 = vpop.f32.mrf.mxu0 }
0x1135   :  { %v2256_v35 = vpop.f32.mrf.mxu0 }
0x1137   :  { %v1343_v52 = vpop.f32.mrf.mxu0  ;;  %v1387_v53 = vpop.f32.mrf.mxu1 }
0x1138   :  { %v1388_v54 = vadd.f32 %v1387_v53, %v1340_v51 }
0x1139   :  { %v2257_v57 = vpop.f32.mrf.mxu0  ;;  %v2264_v30 = vpop.f32.mrf.mxu1 }
0x113a   :  { %v1394_v59 = vadd.f32 %v2959_v41, %v1388_v54 }
0x113b   :  { %v1390_v60 = vpop.f32.mrf.mxu1  ;;  %v1472_v44 = vpop.f32.mrf.mxu0 }
0x113c   :  { %2423 = vtanh.f32 %v1394_v59  ;;  %v1391_v61 = vadd.f32 %v1390_v60, %v1343_v52  ;;  %v1479_v63 = vadd.f32 %v1472_v44, %v1436_v40 }
0x113d   :  { %v2265_v49 = vpop.f32.mrf.mxu1  ;;  %v2272_v5 = vpop.f32.mrf.mxu0 }
0x113e   :  { %v1395_v7 = vadd.f32 %v2959_v41, %v1391_v61  ;;  %2425 = vtanh.f32 %v1479_v63 }
0x113f   :  { %v1475_v10 = vpop.f32.mrf.mxu0 }
0x1140   :  { %2427 = vtanh.f32 %v1395_v7  ;;  %v1480_v50 = vadd.f32 %v1475_v10, %v1437_v6 }
0x1141   :  { %v2273_v55 = vpop.f32.mrf.mxu0 }
0x1142   :  { %2429 = vtanh.f32 %v1480_v50 }
0x1149   :  { %v2424_v56 = vpop.eup %2423 }
0x114a   :  { %1406 = vrot.lane.b32.xlu0 %v2424_v56, %s2481_s30  ;;  %v1398_v15 = vmul.f32 0.5, %v2424_v56 }
0x114b   :  { %v2426_v12 = vpop.eup %2425 }
0x114c   :  { %v1400_v16 = vadd.f32 0.5, %v1398_v15  ;;  %v1483_v17 = vmul.f32 0.5, %v2426_v12 }
0x114d   :  { %v2428_v13 = vpop.eup %2427 }
0x114e   :  { %1491 = vrot.lane.b32.xlu0 %v2426_v12, %s2481_s30  ;;  %1408 = vrot.lane.b32.xlu1 %v2428_v13, %s2481_s30  ;;  %v1399_v20 = vmul.f32 0.5, %v2428_v13  ;;  %v1485_v22 = vadd.f32 0.5, %v1483_v17  ;;  %v1402_v21 = vmul.f32 %v1400_v16, %v2891_v9  ;;  %v1660_v12 = vld [vmem:[%s3110_s0 + $0x78] sm:$0xff] }
0x114f   :  { %v2430_v14 = vpop.eup %2429 }
0x1150   :  { %v1401_v3 = vadd.f32 0.5, %v1399_v20  ;;  %v1484_v11 = vmul.f32 0.5, %v2430_v14  ;;  %v1487_v36 = vmul.f32 %v1485_v22, %v2896_v1 }
0x1152   :  { %1493 = vrot.lane.b32.xlu1 %v2430_v14, %s2481_s30  ;;  %v1486_v19 = vadd.f32 0.5, %v1484_v11  ;;  %v1403_v38 = vmul.f32 %v1401_v3, %v2898_v2 }
0x1154   :  { %v1488_v28 = vmul.f32 %v1486_v19, %v2903_v24 }
0x11bc   :  { %v1407_v62 = vpop.permute.xlu0 %1406 }
0x11bd   :  { %v1412_v8 = vmul.f32 %v1407_v62, %v1400_v16 }
0x11bf   :  { %1416 = vrot.lane.b32.xlu0 %v1412_v8, %s2482_s6 }
0x11c0   :  { %v1492_v4 = vpop.permute.xlu0 %1491  ;;  %v1409_v23 = vpop.permute.xlu1 %1408 }
0x11c1   :  { %v1497_v58 = vmul.f32 %v1492_v4, %v1485_v22  ;;  %v1413_v18 = vmul.f32 %v1409_v23, %v1401_v3 }
0x11c3   :  { %1501 = vrot.lane.b32.xlu0 %v1497_v58, %s2482_s6  ;;  %1418 = vrot.lane.b32.xlu1 %v1413_v18, %s2482_s6 }
0x11c4   :  { %v1494_v25 = vpop.permute.xlu1 %1493 }
0x11c5   :  { %v1498_v26 = vmul.f32 %v1494_v25, %v1486_v19 }
0x11c7   :  { %1503 = vrot.lane.b32.xlu1 %v1498_v26, %s2482_s6 }
0x1231   :  { %v1417_v27 = vpop.permute.xlu0 %1416 }
0x1232   :  { %v2975_v29 = vadd.f32 %v1417_v27, %v1402_v21 }
0x1234   :  { %2431 = vtanh.f32 %v2975_v29 }
0x1235   :  { %v1502_v32 = vpop.permute.xlu0 %1501  ;;  %v1419_v42 = vpop.permute.xlu1 %1418 }
0x1236   :  { %v2980_v43 = vadd.f32 %v1502_v32, %v1487_v36  ;;  %v2982_v45 = vadd.f32 %v1419_v42, %v1403_v38 }
0x1238   :  { %2433 = vtanh.f32 %v2980_v43 }
0x1239   :  { %2435 = vtanh.f32 %v2982_v45  ;;  %v1504_v9 = vpop.permute.xlu1 %1503 }
0x123a   :  { %v2987_v46 = vadd.f32 %v1504_v9, %v1488_v28 }
0x123c   :  { %2437 = vtanh.f32 %v2987_v46 }
0x1241   :  { %v2432_v1 = vpop.eup %2431 }
0x1242   :  { %1428 = vrot.lane.b32.xlu0 %v2432_v1, %s2481_s30 }
0x1245   :  { %v2434_v2 = vpop.eup %2433 }
0x1246   :  { %v2436_v33 = vpop.eup %2435  ;;  %1513 = vrot.lane.b32.xlu0 %v2434_v2, %s2481_s30 }
0x1247   :  { %1430 = vrot.lane.b32.xlu1 %v2436_v33, %s2481_s30 }
0x1249   :  { %v2438_v51 = vpop.eup %2437 }
0x124b   :  { %1515 = vrot.lane.b32.xlu1 %v2438_v51, %s2481_s30 }
0x12b4   :  { %v1429_v24 = vpop.permute.xlu0 %1428 }
0x12b5   :  { %v1434_v52 = vmul.f32 %v1429_v24, %v1400_v16 }
0x12b8   :  { %v1514_v54 = vpop.permute.xlu0 %1513 }
0x12b9   :  { %v1431_v35 = vpop.permute.xlu1 %1430  ;;  %v1519_v40 = vmul.f32 %v1514_v54, %v1485_v22 }
0x12ba   :  { %v1435_v53 = vmul.f32 %v1431_v35, %v1401_v3 }
0x12bc   :  { %v1522_v57 = vpack.c.bf16 %v1435_v53, %v1434_v52 }
0x12bd   :  { %v1516_v30 = vpop.permute.xlu1 %1515 }
0x12be   :  { %v1520_v59 = vmul.f32 %v1516_v30, %v1486_v19  ;;  %1524 = vrot.lane.b32.xlu0 %v1522_v57, %s2482_s6 }
0x12c0   :  { %v1521_v60 = vpack.c.bf16 %v1520_v59, %v1519_v40 }
0x12c2   :  { %1571 = vrot.lane.b32.xlu1 %v1521_v60, %s2482_s6 }
0x1330   :  { %v1525_v44 = vpop.permute.xlu0 %1524 }
0x1331   :  { %2279 = vmatmul.mubr.msk.bf16.vlgmr.msra.gmra.mxu1 %vm55_vm1, %v1525_v44 }
0x1332   :  { %2291 = vmatpush3.bf16.msra.mxu1 %v2847_v37  ;;  %2294 = vmatprep.mubr.msk.bf16.mxu1 %vm2479_vm0, %v2478_v0 }
0x1333   :  { %2292 = vmatprep.subr.bf16.mxu1 %v2478_v0 }
0x1334   :  { %v1572_v61 = vpop.permute.xlu1 %1571 }
0x1335   :  { %2287 = vmatmul.mubr.msk.bf16.vlgmr.msra.gmra.mxu0 %vm55_vm1, %v1572_v61 }
0x1336   :  { %2293 = vmatpush3.bf16.msra.mxu1 %v2857_v39  ;;  %2299 = vmatpush3.bf16.msra.mxu0 %v2922_v34 }
0x1337   :  { %2306 = vmatprep.subr.bf16.mxu1 %v2478_v0  ;;  %2300 = vmatprep.subr.bf16.mxu0 %v2478_v0 }
0x1338   :  { %2302 = vmatprep.mubr.msk.bf16.mxu0 %vm2479_vm0, %v2478_v0 }
0x1339   :  { %2295 = vmatmul.mubr.msk.bf16.vlgmr.msra.gmra.mxu1 %vm55_vm1, %v1572_v61 }
0x133a   :  { %2307 = vmatpush3.bf16.msra.mxu1 %v2933_v47  ;;  %2301 = vmatpush3.bf16.msra.mxu0 %v2939_v31  ;;  %v1659_v47 = vld [vmem:[%s3110_s0 + $0x70] sm:$0xff] }
0x133b   :  { %2308 = vmatprep.subr.bf16.mxu1 %v2478_v0  ;;  %2310 = vmatprep.mubr.msk.bf16.mxu1 %vm2479_vm0, %v2478_v0 }
0x133c   :  { %2314 = vmatprep.subr.bf16.mxu0 %v2478_v0 }
0x133e   :  { %2309 = vmatpush3.bf16.msra.mxu1 %v2949_v48 }
0x13f1   :  { %v1563_v37 = vpop.f32.mrf.mxu1 }
0x13f3   :  { %v2280_v39 = vpop.f32.mrf.mxu1 }
0x13f5   :  { %v1566_v34 = vpop.f32.mrf.mxu1  ;;  %v1610_v63 = vpop.f32.mrf.mxu0 }
0x13f6   :  { %v1611_v49 = vadd.f32 %v1610_v63, %v1563_v37 }
0x13f7   :  { %v2281_v5 = vpop.f32.mrf.mxu1  ;;  %v2288_v6 = vpop.f32.mrf.mxu0 }
0x13f8   :  { %v1617_v31 = vadd.f32 %v2959_v41, %v1611_v49 }
0x13f9   :  { %v1613_v7 = vpop.f32.mrf.mxu0  ;;  %v1695_v10 = vpop.f32.mrf.mxu1 }
0x13fa   :  { %2439 = vtanh.f32 %v1617_v31  ;;  %v1614_v50 = vadd.f32 %v1613_v7, %v1566_v34  ;;  %v1702_v55 = vadd.f32 %v1695_v10, %v1659_v47 }
0x13fb   :  { %v2289_v56 = vpop.f32.mrf.mxu0  ;;  %v2296_v48 = vpop.f32.mrf.mxu1 }
0x13fc   :  { %v1618_v13 = vadd.f32 %v2959_v41, %v1614_v50  ;;  %2441 = vtanh.f32 %v1702_v55 }
0x13fd   :  { %v1698_v14 = vpop.f32.mrf.mxu1 }
0x13fe   :  { %2443 = vtanh.f32 %v1618_v13  ;;  %v1703_v15 = vadd.f32 %v1698_v14, %v1660_v12 }
0x13ff   :  { %v2297_v16 = vpop.f32.mrf.mxu1 }
0x1400   :  { %2445 = vtanh.f32 %v1703_v15 }
0x1407   :  { %v2440_v17 = vpop.eup %2439 }
0x1408   :  { %1629 = vrot.lane.b32.xlu0 %v2440_v17, %s2481_s30  ;;  %v1621_v22 = vmul.f32 0.5, %v2440_v17 }
0x1409   :  { %v2442_v20 = vpop.eup %2441 }
0x140a   :  { %v1623_v3 = vadd.f32 0.5, %v1621_v22  ;;  %v1706_v4 = vmul.f32 0.5, %v2442_v20 }
0x140b   :  { %v2444_v62 = vpop.eup %2443 }
0x140c   :  { %1631 = vrot.lane.b32.xlu1 %v2444_v62, %s2481_s30  ;;  %1714 = vrot.lane.b32.xlu0 %v2442_v20, %s2481_s30  ;;  %v1622_v11 = vmul.f32 0.5, %v2444_v62  ;;  %v1708_v19 = vadd.f32 0.5, %v1706_v4  ;;  %v1625_v28 = vmul.f32 %v1623_v3, %v2975_v29 }
0x140d   :  { %v2446_v8 = vpop.eup %2445 }
0x140e   :  { %v1624_v18 = vadd.f32 0.5, %v1622_v11  ;;  %v1707_v25 = vmul.f32 0.5, %v2446_v8  ;;  %v1710_v2 = vmul.f32 %v1708_v19, %v2980_v43 }
0x1410   :  { %1716 = vrot.lane.b32.xlu1 %v2446_v8, %s2481_s30  ;;  %v1709_v38 = vadd.f32 0.5, %v1707_v25  ;;  %v1626_v33 = vmul.f32 %v1624_v18, %v2982_v45 }
0x1412   :  { %v1711_v53 = vmul.f32 %v1709_v38, %v2987_v46 }
0x147a   :  { %v1630_v23 = vpop.permute.xlu0 %1629 }
0x147b   :  { %v1635_v58 = vmul.f32 %v1630_v23, %v1623_v3 }
0x147d   :  { %1639 = vrot.lane.b32.xlu0 %v1635_v58, %s2482_s6 }
0x147e   :  { %v1632_v26 = vpop.permute.xlu1 %1631  ;;  %v1715_v21 = vpop.permute.xlu0 %1714 }
0x147f   :  { %v1636_v27 = vmul.f32 %v1632_v26, %v1624_v18  ;;  %v1720_v36 = vmul.f32 %v1715_v21, %v1708_v19 }
0x1481   :  { %1724 = vrot.lane.b32.xlu0 %v1720_v36, %s2482_s6  ;;  %1641 = vrot.lane.b32.xlu1 %v1636_v27, %s2482_s6  ;;  %v2333_v27 = vld [vmem:[%s3108_s2 + $0x38] sm:$0xff]   ;;  %v2334_v36 = vld [vmem:[%s3108_s2 + $0x30] sm:$0xff]  }
0x1482   :  { %v1717_v32 = vpop.permute.xlu1 %1716 }
0x1483   :  { %v1721_v42 = vmul.f32 %v1717_v32, %v1709_v38 }
0x1485   :  { %1726 = vrot.lane.b32.xlu1 %v1721_v42, %s2482_s6 }
0x14ef   :  { %v1640_v9 = vpop.permute.xlu0 %1639 }
0x14f0   :  { %v3033_v1 = vadd.f32 %v1640_v9, %v1625_v28 }
0x14f2   :  { %2447 = vtanh.f32 %v3033_v1 }
0x14f3   :  { %v1725_v51 = vpop.permute.xlu0 %1724  ;;  %v1642_v24 = vpop.permute.xlu1 %1641 }
0x14f4   :  { %v3038_v35 = vadd.f32 %v1725_v51, %v1710_v2  ;;  %v3040_v52 = vadd.f32 %v1642_v24, %v1626_v33 }
0x14f6   :  { %2449 = vtanh.f32 %v3038_v35 }
0x14f7   :  { %2451 = vtanh.f32 %v3040_v52  ;;  %v1727_v29 = vpop.permute.xlu1 %1726 }
0x14f8   :  { %v3045_v54 = vadd.f32 %v1727_v29, %v1711_v53 }
0x14fa   :  { %2453 = vtanh.f32 %v3045_v54 }
0x14ff   :  { %v2448_v43 = vpop.eup %2447 }
0x1500   :  { %1651 = vrot.lane.b32.xlu0 %v2448_v43, %s2481_s30 }
0x1503   :  { %v2450_v45 = vpop.eup %2449 }
0x1504   :  { %v2452_v57 = vpop.eup %2451  ;;  %1736 = vrot.lane.b32.xlu0 %v2450_v45, %s2481_s30 }
0x1505   :  { %1653 = vrot.lane.b32.xlu1 %v2452_v57, %s2481_s30 }
0x1507   :  { %v2454_v30 = vpop.eup %2453 }
0x1509   :  { %1738 = vrot.lane.b32.xlu1 %v2454_v30, %s2481_s30 }
0x1572   :  { %v1652_v46 = vpop.permute.xlu0 %1651 }
0x1573   :  { %v1657_v59 = vmul.f32 %v1652_v46, %v1623_v3  ;;  %v2041_v46 = vld [vmem:[%s3111_s3 + $0x1] ss:$0 sm:$0xff] }
0x1576   :  { %v1737_v44 = vpop.permute.xlu0 %1736 }
0x1577   :  { %v1654_v40 = vpop.permute.xlu1 %1653  ;;  %v1742_v39 = vmul.f32 %v1737_v44, %v1708_v19 }
0x1578   :  { %v1658_v60 = vmul.f32 %v1654_v40, %v1624_v18 }
0x157a   :  { %v1745_v61 = vpack.c.bf16 %v1658_v60, %v1657_v59 }
0x157b   :  { %v1739_v37 = vpop.permute.xlu1 %1738 }
0x157c   :  { %v3052_v34 = vmul.f32 %v1739_v37, %v1709_v38  ;;  %1747 = vrot.lane.b32.xlu0 %v1745_v61, %s2482_s6 }
0x157e   :  { %v1744_v63 = vpack.c.bf16 %v3052_v34, %v1742_v39 }
0x1580   :  { %1794 = vrot.lane.b32.xlu1 %v1744_v63, %s2482_s6 }
0x15ee   :  { %v1748_v49 = vpop.permute.xlu0 %1747 }
0x15ef   :  { %2303 = vmatmul.mubr.msk.bf16.vlgmr.msra.gmra.mxu0 %vm55_vm1, %v1748_v49 }
0x15f0   :  { %2318 = vmatprep.mubr.msk.bf16.mxu0 %vm2479_vm0, %v2478_v0  ;;  %2315 = vmatpush3.bf16.msra.mxu0 %v2333_v27 }
0x15f1   :  { %2316 = vmatprep.subr.bf16.mxu0 %v2478_v0 }
0x15f2   :  { %v1795_v5 = vpop.permute.xlu1 %1794 }
0x15f3   :  { %2311 = vmatmul.mubr.msk.bf16.vlgmr.msra.gmra.mxu1 %vm55_vm1, %v1795_v5 }
0x15f4   :  { %2317 = vmatpush3.bf16.msra.mxu0 %v2334_v36 }
0x16af   :  { %v1786_v6 = vpop.f32.mrf.mxu0 }
0x16b1   :  { %v2304_v47 = vpop.f32.mrf.mxu0 }
0x16b3   :  { %v1789_v31 = vpop.f32.mrf.mxu0  ;;  %v1833_v7 = vpop.f32.mrf.mxu1 }
0x16b4   :  { %v1834_v10 = vadd.f32 %v1833_v7, %v1786_v6 }
0x16b5   :  { %v2305_v50 = vpop.f32.mrf.mxu0  ;;  %v2312_v55 = vpop.f32.mrf.mxu1 }
0x16b6   :  { %v1840_v56 = vadd.f32 %v2959_v41, %v1834_v10 }
0x16b7   :  { %v1836_v48 = vpop.f32.mrf.mxu1 }
0x16b8   :  { %2455 = vtanh.f32 %v1840_v56  ;;  %v1837_v12 = vadd.f32 %v1836_v48, %v1789_v31 }
0x16b9   :  { %v2313_v13 = vpop.f32.mrf.mxu1 }
0x16ba   :  { %v1841_v14 = vadd.f32 %v2959_v41, %v1837_v12 }
0x16bc   :  { %2457 = vtanh.f32 %v1841_v14 }
0x16c5   :  { %v2456_v15 = vpop.eup %2455 }
0x16c6   :  { %1852 = vrot.lane.b32.xlu0 %v2456_v15, %s2481_s30  ;;  %v1844_v17 = vmul.f32 0.5, %v2456_v15 }
0x16c8   :  { %v1846_v20 = vadd.f32 0.5, %v1844_v17 }
0x16c9   :  { %v2458_v16 = vpop.eup %2457 }
0x16ca   :  { %1854 = vrot.lane.b32.xlu1 %v2458_v16, %s2481_s30  ;;  %v1845_v62 = vmul.f32 0.5, %v2458_v16  ;;  %v1848_v41 = vmul.f32 %v1846_v20, %v3033_v1 }
0x16cc   :  { %v1847_v3 = vadd.f32 0.5, %v1845_v62 }
0x16ce   :  { %v1849_v18 = vmul.f32 %v1847_v3, %v3040_v52 }
0x1738   :  { %v1853_v8 = vpop.permute.xlu0 %1852 }
0x1739   :  { %v1858_v22 = vmul.f32 %v1853_v8, %v1846_v20 }
0x173b   :  { %1862 = vrot.lane.b32.xlu0 %v1858_v22, %s2482_s6 }
0x173c   :  { %v1855_v11 = vpop.permute.xlu1 %1854 }
0x173d   :  { %v1859_v4 = vmul.f32 %v1855_v11, %v1847_v3 }
0x173f   :  { %1864 = vrot.lane.b32.xlu1 %v1859_v4, %s2482_s6 }
0x17ad   :  { %v1863_v23 = vpop.permute.xlu0 %1862 }
0x17ae   :  { %v1868_v58 = vadd.f32 %v1863_v23, %v1848_v41 }
0x17b0   :  { %2459 = vtanh.f32 %v1868_v58 }
0x17b1   :  { %v1865_v19 = vpop.permute.xlu1 %1864 }
0x17b2   :  { %v1869_v25 = vadd.f32 %v1865_v19, %v1849_v18 }
0x17b4   :  { %2461 = vtanh.f32 %v1869_v25 }
0x17bd   :  { %v2460_v26 = vpop.eup %2459 }
0x17be   :  { %1874 = vrot.lane.b32.xlu0 %v2460_v26, %s2481_s30 }
0x17c1   :  { %v2462_v21 = vpop.eup %2461 }
0x17c2   :  { %1876 = vrot.lane.b32.xlu1 %v2462_v21, %s2481_s30 }
0x17c6   :  { %1884 = vrot.lane.b32.xlu1 %v1742_v39, %s2482_s6 }
0x1830   :  { %v1875_v38 = vpop.permute.xlu0 %1874 }
0x1831   :  { %v1880_v32 = vmul.f32 %v1875_v38, %v1846_v20 }
0x1833   :  { %1892 = vrot.lane.b32.xlu1 %v1880_v32, %s2481_s30 }
0x1834   :  { %v1877_v42 = vpop.permute.xlu1 %1876 }
0x1835   :  { %v1881_v28 = vmul.f32 %v1877_v42, %v1847_v3 }
0x1837   :  { %v1924_v9 = vpack.c.bf16 %v1881_v28, %v1880_v32  ;;  %1900 = vrot.lane.b32.xlu1 %v3038_v35, %s2482_s6 }
0x1838   :  { %v1885_v0 = vpop.permute.xlu1 %1884 }
0x1839   :  { %1930 = vrot.lane.b32.xlu0 %v1924_v9, %s2482_s6 }
0x183b   :  { %1908 = vrot.lane.b32.xlu1 %v1868_v58, %s2481_s30 }
0x183d   :  { %1886 = vrot.lane.b32.xlu0 %v3052_v34, %s2482_s6 }
0x1841   :  { %1894 = vrot.lane.b32.xlu0 %v1881_v28, %s2481_s30 }
0x1845   :  { %1902 = vrot.lane.b32.xlu0 %v3045_v54, %s2482_s6 }
0x1849   :  { %1910 = vrot.lane.b32.xlu0 %v1869_v25, %s2481_s30 }
0x18a5   :  { %v1893_v1 = vpop.permute.xlu1 %1892 }
0x18a6   :  { %v1914_v51 = vsel %vm55_vm1, %v1885_v0, %v1893_v1 }
0x18a9   :  { %v1901_v2 = vpop.permute.xlu1 %1900 }
0x18aa   :  { %v1917_v24 = vsel %vm1916_vm2, %v1914_v51, %v1901_v2 }
0x18ab   :  { %v1931_v33 = vpop.permute.xlu0 %1930 }
0x18ac   :  { %2319 = vmatmul.mubr.msk.bf16.vlgmr.msra.gmra.mxu0 %vm55_vm1, %v1931_v33 }
0x18ad   :  { %v1909_v35 = vpop.permute.xlu1 %1908 }
0x18ae   :  { %v1920_v52 = vsel %vm1919_vm3, %v1917_v24, %v1909_v35 }
0x18af   :  { %1922 = vst [vmem:[%s3112_s5] sm:$0xff] %v1920_v52  ;;  %v1887_v53 = vpop.permute.xlu0 %1886 }
0x18b3   :  { %v1895_v29 = vpop.permute.xlu0 %1894 }
0x18b4   :  { %v1915_v43 = vsel %vm55_vm1, %v1887_v53, %v1895_v29 }
0x18b7   :  { %v1903_v54 = vpop.permute.xlu0 %1902 }
0x18b8   :  { %v1918_v45 = vsel %vm1916_vm2, %v1915_v43, %v1903_v54 }
0x18bb   :  { %v1911_v57 = vpop.permute.xlu0 %1910 }
0x18bc   :  { %v1921_v30 = vsel %vm1919_vm3, %v1918_v45, %v1911_v57 }
0x18bd   :  { %1923 = vst [vmem:[%s3112_s5 + $0x8] sm:$0xff] %v1921_v30 }
0x196c   :  { %v1981_v40 = vpop.f32.mrf.mxu0 }
0x196d   :  { %v1982_v59 = vadd.f32 %v2041_v46, %v1981_v40 }
0x196e   :  { %v2320_v60 = vpop.f32.mrf.mxu0 }
0x196f   :  { %v2045_v44 = vmul.f32 -1.442695, %v1982_v59 }
0x1970   :  { %v1984_v61 = vpop.f32.mrf.mxu0 }
0x1971   :  { %2463 = vpow2.f32 %v2045_v44  ;;  %v1985_v37 = vadd.f32 %v2041_v46, %v1984_v61 }
0x1972   :  { %v2321_v39 = vpop.f32.mrf.mxu0 }
0x1973   :  { %v2046_v34 = vmul.f32 -1.442695, %v1985_v37 }
0x1975   :  { %2465 = vpow2.f32 %v2046_v34 }
0x197e   :  { %v2464_v63 = vpop.eup %2463 }
0x197f   :  { %v1994_v49 = vadd.f32 1.0, %v2464_v63 }
0x1981   :  { %2467 = vrcp.f32 %v1994_v49 }
0x1982   :  { %v2466_v5 = vpop.eup %2465 }
0x1983   :  { %v1995_v6 = vadd.f32 1.0, %v2466_v5 }
0x1985   :  { %2469 = vrcp.f32 %v1995_v6 }
0x198e   :  { %v2468_v47 = vpop.eup %2467 }
0x198f   :  { %2000 = vst [vmem:[%s3113_s4] sm:$0xff] %v2468_v47 }
0x1992   :  { %v2470_v31 = vpop.eup %2469 }
0x1993   :  { %2001 = vst [vmem:[%s3113_s4 + $0x8] sm:$0xff] %v2470_v31 }

</bundles_post_ra>
